<compile_context>
chip_gen: v7x
topology: tpu7x:2x2x1
jax: 0.10.0
libtpu: 0.0.40
codegen_flags: <defaults>
</compile_context>

<pallas_src>
import functools

import jax
import jax.numpy as jnp
from jax.experimental import pallas as pl
from jax.experimental.pallas import tpu as pltpu


# ----------------------------------------------------------------------------
# Fused kernel: conv1 -> conv2 -> conv3 -> NCHW flatten  ||  l1 -> l2 || concat
# ----------------------------------------------------------------------------
def _multi_head_kernel(p1_ref, xv_ref,
                       w1_ref, b1_ref, w2_ref, b2_ref, w3_ref, b3_ref,
                       l1w_ref, l1b_ref, l2w_ref, l2b_ref,
                       out_ref, *,
                       tb, ow1, oh2, ow2, oh3, ow3,
                       kh2, kw2, s2, kh3, kw3, c3):
    f32 = jnp.float32
    p3 = oh3 * ow3

    # ---- conv1: one GEMM over the whole batch tile -------------------------
    # Rows of p1_ref are ordered (output-position, image-in-tile):
    #   row = pos * tb + b_local
    h1 = jnp.dot(p1_ref[...], w1_ref[...], preferred_element_type=f32)
    h1 = jnp.maximum(h1 + b1_ref[...], 0.0)                    # (p1*tb, 32)

    # ---- conv2: build every output-position patch row by lane-concatenating
    # the (kh, kw, cin)-ordered channel vectors, then a single GEMM ----------
    rows2 = []
    for oh in range(oh2):
        for ow in range(ow2):
            pieces = []
            for di in range(kh2):
                for dj in range(kw2):
                    pos = (oh * s2 + di) * ow1 + (ow * s2 + dj)
                    pieces.append(h1[pos * tb:(pos + 1) * tb, :])
            rows2.append(jnp.concatenate(pieces, axis=-1))      # (tb, kh2*kw2*32)
    pat2 = jnp.concatenate(rows2, axis=0)                       # (p2*tb, K2)
    h2 = jnp.dot(pat2.astype(w2_ref.dtype), w2_ref[...],
                 preferred_element_type=f32)
    h2 = jnp.maximum(h2 + b2_ref[...], 0.0)                     # (p2*tb, 64)

    # ---- conv3 (stride 1): same construction from VMEM-resident h2 ---------
    rows3 = []
    for oh in range(oh3):
        for ow in range(ow3):
            pieces = []
            for di in range(kh3):
                for dj in range(kw3):
                    pos = (oh + di) * ow2 + (ow + dj)
                    pieces.append(h2[pos * tb:(pos + 1) * tb, :])
            rows3.append(jnp.concatenate(pieces, axis=-1))      # (tb, kh3*kw3*64)
    pat3 = jnp.concatenate(rows3, axis=0)                       # (p3*tb, K3)
    h3 = jnp.dot(pat3.astype(w3_ref.dtype), w3_ref[...],
                 preferred_element_type=f32)
    h3 = jnp.maximum(h3 + b3_ref[...], 0.0)                     # (p3*tb, 64)

    if p3 == 1:
        conv_flat = h3                                          # rows == images
    else:
        # NCHW flatten order (channel outer, spatial inner), as in PyTorch.
        parts = [h3[p * tb:(p + 1) * tb, :] for p in range(p3)]
        conv_flat = jnp.stack(parts, axis=-1).reshape(tb, c3 * p3)

    # ---- mlp branch ---------------------------------------------------------
    v = jnp.dot(xv_ref[...], l1w_ref[...], preferred_element_type=f32)
    v = jnp.maximum(v + l1b_ref[...], 0.0)
    v = jnp.dot(v.astype(l2w_ref.dtype), l2w_ref[...],
                preferred_element_type=f32)
    v = jnp.maximum(v + l2b_ref[...], 0.0)

    out_ref[...] = jnp.concatenate([conv_flat, v], axis=-1).astype(out_ref.dtype)


# ----------------------------------------------------------------------------
# conv1 im2col glue (pure data movement; runs in XLA, fused under jit)
# ----------------------------------------------------------------------------
def _conv1_patches(x, kh, kw, stride, tb):
    """x: (B, C, H, W), B % tb == 0  ->  patches [(B*OH*OW), kh*kw*C].

    Row order is (batch-tile, output-position, image-in-tile) so the kernel's
    per-tile block is contiguous and every spatial position is a contiguous
    row slice inside the kernel.  Column order is (kh, kw, Cin) to match the
    pre-permuted weights.
    """
    B, C, H, W = x.shape
    OH = (H - kh) // stride + 1
    OW = (W - kw) // stride + 1
    cols = []
    for i in range(kh):
        for j in range(kw):
            cols.append(x[:, :, i:i + stride * OH:stride,
                             j:j + stride * OW:stride])       # (B, C, OH, OW)
    p = jnp.stack(cols, axis=1)                               # (B, kh*kw, C, OH, OW)
    p = p.transpose(0, 3, 4, 1, 2)                            # (B, OH, OW, kh*kw, C)
    p = p.reshape(B // tb, tb, OH * OW, kh * kw * C)
    p = p.transpose(0, 2, 1, 3)                               # (tiles, P, tb, K)
    return p.reshape(B * OH * OW, kh * kw * C), OH, OW


# ----------------------------------------------------------------------------
# Multi head
# ----------------------------------------------------------------------------
def init_multi_params(key, D_in, D_hidden=512):
    D_in_img, D_in_vec = D_in
    C_in, H, W = D_in_img
    assert H >= 36 and W >= 36
    ks = jax.random.split(key, 10)
    s = 0.05
    return {
        "conv1_w": jax.random.normal(ks[0], (32, C_in, 8, 8), jnp.float32) * s,
        "conv1_b": jax.random.normal(ks[1], (32,), jnp.float32) * s,
        "conv2_w": jax.random.normal(ks[2], (64, 32, 4, 4), jnp.float32) * s,
        "conv2_b": jax.random.normal(ks[3], (64,), jnp.float32) * s,
        "conv3_w": jax.random.normal(ks[4], (64, 64, 3, 3), jnp.float32) * s,
        "conv3_b": jax.random.normal(ks[5], (64,), jnp.float32) * s,
        "l1_w": jax.random.normal(ks[6], (D_hidden, D_in_vec), jnp.float32) * s,
        "l1_b": jax.random.normal(ks[7], (D_hidden,), jnp.float32) * s,
        "l2_w": jax.random.normal(ks[8], (D_hidden, D_hidden), jnp.float32) * s,
        "l2_b": jax.random.normal(ks[9], (D_hidden,), jnp.float32) * s,
    }


def multi_forward(params, x_img, x_vec, *, compute_dtype=jnp.float32,
                  batch_tile=8):
    """Forward of Multi.  x_img: (N,C,H,W) or (N,S,C,H,W); x_vec (N,Dv)/(N,S,Dv)."""
    seq = (x_img.ndim == 5)
    if seq:
        batch_len, seq_len = x_img.shape[0], x_img.shape[1]
        x_img = x_img.reshape(-1, *x_img.shape[2:])
        x_vec = x_vec.reshape(-1, x_vec.shape[-1])

    B, c0, H, W = x_img.shape
    assert H >= 36 and W >= 36
    assert x_vec.shape[0] == B
    d_vec = x_vec.shape[-1]

    w1, b1 = params["conv1_w"], params["conv1_b"]
    w2, b2 = params["conv2_w"], params["conv2_b"]
    w3, b3 = params["conv3_w"], params["conv3_b"]
    l1w, l1b = params["l1_w"], params["l1_b"]
    l2w, l2b = params["l2_w"], params["l2_b"]

    c1, _, kh1, kw1 = w1.shape
    c2, _, kh2, kw2 = w2.shape
    c3, _, kh3, kw3 = w3.shape
    s1, s2 = 4, 2
    d_hid = l1b.shape[0]

    oh1, ow1 = (H - kh1) // s1 + 1, (W - kw1) // s1 + 1
    oh2, ow2 = (oh1 - kh2) // s2 + 1, (ow1 - kw2) // s2 + 1
    oh3, ow3 = oh2 - kh3 + 1, ow2 - kw3 + 1
    p1, p2, p3 = oh1 * ow1, oh2 * ow2, oh3 * ow3
    d_conv = c3 * p3
    d_out = d_conv + d_hid

    # ---- batch padding to a multiple of the batch tile ---------------------
    tb = batch_tile
    assert tb % 8 == 0
    b_pad = -(-B // tb) * tb
    if b_pad != B:
        x_img = jnp.pad(x_img, ((0, b_pad - B), (0, 0), (0, 0), (0, 0)))
        x_vec = jnp.pad(x_vec, ((0, b_pad - B), (0, 0)))

    # ---- weight prep (constant folded under jit) ---------------------------
    # 1/255 folded into conv1 weights; all weights pre-permuted to [K, C_out]
    # with K ordered (kh, kw, Cin) to match in-kernel patch construction.
    cd = compute_dtype
    w1d = (w1 / 255.0).transpose(2, 3, 1, 0).reshape(kh1 * kw1 * c0, c1).astype(cd)
    w2d = w2.transpose(2, 3, 1, 0).reshape(kh2 * kw2 * c1, c2).astype(cd)
    w3d = w3.transpose(2, 3, 1, 0).reshape(kh3 * kw3 * c2, c3).astype(cd)
    l1wd = l1w.T.astype(cd)
    l2wd = l2w.T.astype(cd)
    b1r = b1.reshape(1, c1).astype(jnp.float32)
    b2r = b2.reshape(1, c2).astype(jnp.float32)
    b3r = b3.reshape(1, c3).astype(jnp.float32)
    l1br = l1b.reshape(1, d_hid).astype(jnp.float32)
    l2br = l2b.reshape(1, d_hid).astype(jnp.float32)

    patches1, _, _ = _conv1_patches(x_img.astype(cd), kh1, kw1, s1, tb)
    xv = x_vec.astype(cd)

    kernel = functools.partial(
        _multi_head_kernel, tb=tb, ow1=ow1, oh2=oh2, ow2=ow2, oh3=oh3,
        ow3=ow3, kh2=kh2, kw2=kw2, s2=s2, kh3=kh3, kw3=kw3, c3=c3)

    k1, k2, k3 = kh1 * kw1 * c0, kh2 * kw2 * c1, kh3 * kw3 * c2
    flops = 2 * b_pad * (p1 * k1 * c1 + p2 * k2 * c2 + p3 * k3 * c3
                         + d_vec * d_hid + d_hid * d_hid)
    bytes_accessed = 4 * (patches1.size + xv.size + w1d.size + w2d.size
                          + w3d.size + l1wd.size + l2wd.size + b_pad * d_out)

    full = lambda i: (0, 0)
    out = pl.pallas_call(
        kernel,
        out_shape=jax.ShapeDtypeStruct((b_pad, d_out), jnp.float32),
        grid_spec=pltpu.PrefetchScalarGridSpec(
            num_scalar_prefetch=0,
            grid=(b_pad // tb,),
            in_specs=[
                pl.BlockSpec((tb * p1, k1), lambda i: (i, 0)),   # conv1 patches
                pl.BlockSpec((tb, d_vec), lambda i: (i, 0)),     # x_vec
                pl.BlockSpec((k1, c1), full), pl.BlockSpec((1, c1), full),
                pl.BlockSpec((k2, c2), full), pl.BlockSpec((1, c2), full),
                pl.BlockSpec((k3, c3), full), pl.BlockSpec((1, c3), full),
                pl.BlockSpec((d_vec, d_hid), full), pl.BlockSpec((1, d_hid), full),
                pl.BlockSpec((d_hid, d_hid), full), pl.BlockSpec((1, d_hid), full),
            ],
            out_specs=pl.BlockSpec((tb, d_out), lambda i: (i, 0)),
        ),
        compiler_params=pltpu.CompilerParams(
            dimension_semantics=("parallel",),
            vmem_limit_bytes=32 * 1024 * 1024),
        cost_estimate=pl.CostEstimate(flops=int(flops), transcendentals=0,
                                      bytes_accessed=int(bytes_accessed)),
    )(patches1, xv, w1d, b1r, w2d, b2r, w3d, b3r, l1wd, l1br, l2wd, l2br)

    out = out[:B]
    if seq:
        out = out.reshape(batch_len, seq_len, d_out)
    return out


# ----------------------------------------------------------------------------
# Pure-JAX reference (lax.conv) for sanity check
# ----------------------------------------------------------------------------
def _ref_forward(params, x_img, x_vec):
    def conv(x, w, b, s):
        y = jax.lax.conv_general_dilated(
            x, w, window_strides=(s, s), padding="VALID",
            dimension_numbers=("NCHW", "OIHW", "NCHW"))
        return jax.nn.relu(y + b[None, :, None, None])

    h = x_img / 255.0
    h = conv(h, params["conv1_w"], params["conv1_b"], 4)
    h = conv(h, params["conv2_w"], params["conv2_b"], 2)
    h = conv(h, params["conv3_w"], params["conv3_b"], 1)
    h = h.reshape(h.shape[0], -1)
    v = jax.nn.relu(x_vec @ params["l1_w"].T + params["l1_b"])
    v = jax.nn.relu(v @ params["l2_w"].T + params["l2_b"])
    return jnp.concatenate([h, v], axis=-1)


if __name__ == "__main__":
    key = jax.random.PRNGKey(0)
    k_img, k_vec, k_par, k_simg, k_svec = jax.random.split(key, 5)

    # D_in = [(C=4, H=36, W=36), D_vec=8], D_hidden=64, batch=2
    D_in_img = (4, 36, 36)
    D_in_vec = 8
    D_hidden = 64
    batch = 2

    x_img = jax.random.uniform(k_img, (batch,) + D_in_img,
                               jnp.float32, 0.0, 255.0)
    x_vec = jax.random.normal(k_vec, (batch, D_in_vec), jnp.float32)
    params = init_multi_params(k_par, (D_in_img, D_in_vec), D_hidden)

    fwd = jax.jit(multi_forward)

    # --- plain (N, C, H, W) path ---------------------------------------------
    out = jax.block_until_ready(fwd(params, x_img, x_vec))
    assert out.shape == (batch, 64 + D_hidden), out.shape
    ref = jax.block_until_ready(_ref_forward(params, x_img, x_vec))
    assert jnp.allclose(out, ref, atol=2e-3, rtol=2e-3), \
        float(jnp.max(jnp.abs(out - ref)))

    # --- sequence (N, S, C, H, W) path (both branches) ------------------------
    seq_img = jax.random.uniform(k_simg, (2, 3) + D_in_img,
                                 jnp.float32, 0.0, 255.0)
    seq_vec = jax.random.normal(k_svec, (2, 3, D_in_vec), jnp.float32)
    out_seq = jax.block_until_ready(fwd(params, seq_img, seq_vec))
    assert out_seq.shape == (2, 3, 64 + D_hidden), out_seq.shape
    ref_seq = _ref_forward(params, seq_img.reshape(-1, *D_in_img),
                           seq_vec.reshape(-1, D_in_vec)).reshape(2, 3, -1)
    assert jnp.allclose(out_seq, ref_seq, atol=2e-3, rtol=2e-3)

    print("KERNEL_OK")
</pallas_src>

<mosaic_0001>
module attributes {stable_mosaic.version = 11 : i64} {
  func.func @_multi_head_kernel(%arg0: i32, %arg1: memref<512x256xf32, #tpu.memory_space<vmem>>, %arg2: memref<8x8xf32, #tpu.memory_space<vmem>>, %arg3: memref<256x32xf32, #tpu.memory_space<vmem>>, %arg4: memref<1x32xf32, #tpu.memory_space<vmem>>, %arg5: memref<512x64xf32, #tpu.memory_space<vmem>>, %arg6: memref<1x64xf32, #tpu.memory_space<vmem>>, %arg7: memref<576x64xf32, #tpu.memory_space<vmem>>, %arg8: memref<1x64xf32, #tpu.memory_space<vmem>>, %arg9: memref<8x64xf32, #tpu.memory_space<vmem>>, %arg10: memref<1x64xf32, #tpu.memory_space<vmem>>, %arg11: memref<64x64xf32, #tpu.memory_space<vmem>>, %arg12: memref<1x64xf32, #tpu.memory_space<vmem>>, %arg13: memref<8x128xf32, #tpu.memory_space<vmem>>) attributes {dimension_semantics = [#tpu.dimension_semantics<parallel>], iteration_bounds = array<i64: 1>, scalar_prefetch = 0 : i64, scratch_operands = 0 : i64, tpu.core_type = #tpu.core_type<tc>, window_params = [{transform_indices = @transform_0, window_bounds = array<i64: 512, 256>}, {transform_indices = @transform_1, window_bounds = array<i64: 8, 8>}, {pipeline_mode = #tpu.pipeline_mode<synchronous>, transform_indices = @transform_2, window_bounds = array<i64: 256, 32>}, {pipeline_mode = #tpu.pipeline_mode<synchronous>, transform_indices = @transform_3, window_bounds = array<i64: 1, 32>}, {pipeline_mode = #tpu.pipeline_mode<synchronous>, transform_indices = @transform_4, window_bounds = array<i64: 512, 64>}, {pipeline_mode = #tpu.pipeline_mode<synchronous>, transform_indices = @transform_5, window_bounds = array<i64: 1, 64>}, {pipeline_mode = #tpu.pipeline_mode<synchronous>, transform_indices = @transform_6, window_bounds = array<i64: 576, 64>}, {pipeline_mode = #tpu.pipeline_mode<synchronous>, transform_indices = @transform_7, window_bounds = array<i64: 1, 64>}, {pipeline_mode = #tpu.pipeline_mode<synchronous>, transform_indices = @transform_8, window_bounds = array<i64: 8, 64>}, {pipeline_mode = #tpu.pipeline_mode<synchronous>, transform_indices = @transform_9, window_bounds = array<i64: 1, 64>}, {pipeline_mode = #tpu.pipeline_mode<synchronous>, transform_indices = @transform_10, window_bounds = array<i64: 64, 64>}, {pipeline_mode = #tpu.pipeline_mode<synchronous>, transform_indices = @transform_11, window_bounds = array<i64: 1, 64>}, {transform_indices = @transform_12, window_bounds = array<i64: 8, 128>}]} {
    %c0 = arith.constant 0 : index
    %c0_0 = arith.constant 0 : index
    %0 = vector.load %arg1[%c0, %c0_0] : memref<512x256xf32, #tpu.memory_space<vmem>>, vector<512x256xf32>
    %c0_1 = arith.constant 0 : index
    %c0_2 = arith.constant 0 : index
    %1 = vector.load %arg3[%c0_1, %c0_2] : memref<256x32xf32, #tpu.memory_space<vmem>>, vector<256x32xf32>
    %cst = arith.constant dense<0.000000e+00> : vector<512x32xf32>
    %2 = tpu.matmul %0, %1, %cst {dimension_numbers = #tpu.dot_dimension_numbers<[1], [0], [0], [1], [0, 0, 1, 1], [], []>} : vector<512x256xf32>, vector<256x32xf32>, vector<512x32xf32> -> vector<512x32xf32>
    %c0_3 = arith.constant 0 : index
    %c0_4 = arith.constant 0 : index
    %3 = vector.load %arg4[%c0_3, %c0_4] : memref<1x32xf32, #tpu.memory_space<vmem>>, vector<1x32xf32>
    %4 = vector.broadcast %3 : vector<1x32xf32> to vector<512x32xf32>
    %5 = arith.addf %2, %4 : vector<512x32xf32>
    %cst_5 = arith.constant 0.000000e+00 : f32
    %6 = vector.broadcast %cst_5 : f32 to vector<512x32xf32>
    %7 = arith.maximumf %5, %6 : vector<512x32xf32>
    %8 = vector.extract_strided_slice %7 {offsets = [0, 0], sizes = [8, 32], strides = [1, 1]} : vector<512x32xf32> to vector<8x32xf32>
    %9 = vector.extract_strided_slice %7 {offsets = [8, 0], sizes = [8, 32], strides = [1, 1]} : vector<512x32xf32> to vector<8x32xf32>
    %10 = vector.extract_strided_slice %7 {offsets = [16, 0], sizes = [8, 32], strides = [1, 1]} : vector<512x32xf32> to vector<8x32xf32>
    %11 = vector.extract_strided_slice %7 {offsets = [24, 0], sizes = [8, 32], strides = [1, 1]} : vector<512x32xf32> to vector<8x32xf32>
    %12 = vector.extract_strided_slice %7 {offsets = [64, 0], sizes = [8, 32], strides = [1, 1]} : vector<512x32xf32> to vector<8x32xf32>
    %13 = vector.extract_strided_slice %7 {offsets = [72, 0], sizes = [8, 32], strides = [1, 1]} : vector<512x32xf32> to vector<8x32xf32>
    %14 = vector.extract_strided_slice %7 {offsets = [80, 0], sizes = [8, 32], strides = [1, 1]} : vector<512x32xf32> to vector<8x32xf32>
    %15 = vector.extract_strided_slice %7 {offsets = [88, 0], sizes = [8, 32], strides = [1, 1]} : vector<512x32xf32> to vector<8x32xf32>
    %16 = vector.extract_strided_slice %7 {offsets = [128, 0], sizes = [8, 32], strides = [1, 1]} : vector<512x32xf32> to vector<8x32xf32>
    %17 = vector.extract_strided_slice %7 {offsets = [136, 0], sizes = [8, 32], strides = [1, 1]} : vector<512x32xf32> to vector<8x32xf32>
    %18 = vector.extract_strided_slice %7 {offsets = [144, 0], sizes = [8, 32], strides = [1, 1]} : vector<512x32xf32> to vector<8x32xf32>
    %19 = vector.extract_strided_slice %7 {offsets = [152, 0], sizes = [8, 32], strides = [1, 1]} : vector<512x32xf32> to vector<8x32xf32>
    %20 = vector.extract_strided_slice %7 {offsets = [192, 0], sizes = [8, 32], strides = [1, 1]} : vector<512x32xf32> to vector<8x32xf32>
    %21 = vector.extract_strided_slice %7 {offsets = [200, 0], sizes = [8, 32], strides = [1, 1]} : vector<512x32xf32> to vector<8x32xf32>
    %22 = vector.extract_strided_slice %7 {offsets = [208, 0], sizes = [8, 32], strides = [1, 1]} : vector<512x32xf32> to vector<8x32xf32>
    %23 = vector.extract_strided_slice %7 {offsets = [216, 0], sizes = [8, 32], strides = [1, 1]} : vector<512x32xf32> to vector<8x32xf32>
    %24 = tpu.concatenate %8, %9, %10, %11, %12, %13, %14, %15, %16, %17, %18, %19, %20, %21, %22, %23 in 1 : vector<8x32xf32>, vector<8x32xf32>, vector<8x32xf32>, vector<8x32xf32>, vector<8x32xf32>, vector<8x32xf32>, vector<8x32xf32>, vector<8x32xf32>, vector<8x32xf32>, vector<8x32xf32>, vector<8x32xf32>, vector<8x32xf32>, vector<8x32xf32>, vector<8x32xf32>, vector<8x32xf32>, vector<8x32xf32> -> vector<8x512xf32>
    %25 = vector.extract_strided_slice %7 {offsets = [16, 0], sizes = [8, 32], strides = [1, 1]} : vector<512x32xf32> to vector<8x32xf32>
    %26 = vector.extract_strided_slice %7 {offsets = [24, 0], sizes = [8, 32], strides = [1, 1]} : vector<512x32xf32> to vector<8x32xf32>
    %27 = vector.extract_strided_slice %7 {offsets = [32, 0], sizes = [8, 32], strides = [1, 1]} : vector<512x32xf32> to vector<8x32xf32>
    %28 = vector.extract_strided_slice %7 {offsets = [40, 0], sizes = [8, 32], strides = [1, 1]} : vector<512x32xf32> to vector<8x32xf32>
    %29 = vector.extract_strided_slice %7 {offsets = [80, 0], sizes = [8, 32], strides = [1, 1]} : vector<512x32xf32> to vector<8x32xf32>
    %30 = vector.extract_strided_slice %7 {offsets = [88, 0], sizes = [8, 32], strides = [1, 1]} : vector<512x32xf32> to vector<8x32xf32>
    %31 = vector.extract_strided_slice %7 {offsets = [96, 0], sizes = [8, 32], strides = [1, 1]} : vector<512x32xf32> to vector<8x32xf32>
    %32 = vector.extract_strided_slice %7 {offsets = [104, 0], sizes = [8, 32], strides = [1, 1]} : vector<512x32xf32> to vector<8x32xf32>
    %33 = vector.extract_strided_slice %7 {offsets = [144, 0], sizes = [8, 32], strides = [1, 1]} : vector<512x32xf32> to vector<8x32xf32>
    %34 = vector.extract_strided_slice %7 {offsets = [152, 0], sizes = [8, 32], strides = [1, 1]} : vector<512x32xf32> to vector<8x32xf32>
    %35 = vector.extract_strided_slice %7 {offsets = [160, 0], sizes = [8, 32], strides = [1, 1]} : vector<512x32xf32> to vector<8x32xf32>
    %36 = vector.extract_strided_slice %7 {offsets = [168, 0], sizes = [8, 32], strides = [1, 1]} : vector<512x32xf32> to vector<8x32xf32>
    %37 = vector.extract_strided_slice %7 {offsets = [208, 0], sizes = [8, 32], strides = [1, 1]} : vector<512x32xf32> to vector<8x32xf32>
    %38 = vector.extract_strided_slice %7 {offsets = [216, 0], sizes = [8, 32], strides = [1, 1]} : vector<512x32xf32> to vector<8x32xf32>
    %39 = vector.extract_strided_slice %7 {offsets = [224, 0], sizes = [8, 32], strides = [1, 1]} : vector<512x32xf32> to vector<8x32xf32>
    %40 = vector.extract_strided_slice %7 {offsets = [232, 0], sizes = [8, 32], strides = [1, 1]} : vector<512x32xf32> to vector<8x32xf32>
    %41 = tpu.concatenate %25, %26, %27, %28, %29, %30, %31, %32, %33, %34, %35, %36, %37, %38, %39, %40 in 1 : vector<8x32xf32>, vector<8x32xf32>, vector<8x32xf32>, vector<8x32xf32>, vector<8x32xf32>, vector<8x32xf32>, vector<8x32xf32>, vector<8x32xf32>, vector<8x32xf32>, vector<8x32xf32>, vector<8x32xf32>, vector<8x32xf32>, vector<8x32xf32>, vector<8x32xf32>, vector<8x32xf32>, vector<8x32xf32> -> vector<8x512xf32>
    %42 = vector.extract_strided_slice %7 {offsets = [32, 0], sizes = [8, 32], strides = [1, 1]} : vector<512x32xf32> to vector<8x32xf32>
    %43 = vector.extract_strided_slice %7 {offsets = [40, 0], sizes = [8, 32], strides = [1, 1]} : vector<512x32xf32> to vector<8x32xf32>
    %44 = vector.extract_strided_slice %7 {offsets = [48, 0], sizes = [8, 32], strides = [1, 1]} : vector<512x32xf32> to vector<8x32xf32>
    %45 = vector.extract_strided_slice %7 {offsets = [56, 0], sizes = [8, 32], strides = [1, 1]} : vector<512x32xf32> to vector<8x32xf32>
    %46 = vector.extract_strided_slice %7 {offsets = [96, 0], sizes = [8, 32], strides = [1, 1]} : vector<512x32xf32> to vector<8x32xf32>
    %47 = vector.extract_strided_slice %7 {offsets = [104, 0], sizes = [8, 32], strides = [1, 1]} : vector<512x32xf32> to vector<8x32xf32>
    %48 = vector.extract_strided_slice %7 {offsets = [112, 0], sizes = [8, 32], strides = [1, 1]} : vector<512x32xf32> to vector<8x32xf32>
    %49 = vector.extract_strided_slice %7 {offsets = [120, 0], sizes = [8, 32], strides = [1, 1]} : vector<512x32xf32> to vector<8x32xf32>
    %50 = vector.extract_strided_slice %7 {offsets = [160, 0], sizes = [8, 32], strides = [1, 1]} : vector<512x32xf32> to vector<8x32xf32>
    %51 = vector.extract_strided_slice %7 {offsets = [168, 0], sizes = [8, 32], strides = [1, 1]} : vector<512x32xf32> to vector<8x32xf32>
    %52 = vector.extract_strided_slice %7 {offsets = [176, 0], sizes = [8, 32], strides = [1, 1]} : vector<512x32xf32> to vector<8x32xf32>
    %53 = vector.extract_strided_slice %7 {offsets = [184, 0], sizes = [8, 32], strides = [1, 1]} : vector<512x32xf32> to vector<8x32xf32>
    %54 = vector.extract_strided_slice %7 {offsets = [224, 0], sizes = [8, 32], strides = [1, 1]} : vector<512x32xf32> to vector<8x32xf32>
    %55 = vector.extract_strided_slice %7 {offsets = [232, 0], sizes = [8, 32], strides = [1, 1]} : vector<512x32xf32> to vector<8x32xf32>
    %56 = vector.extract_strided_slice %7 {offsets = [240, 0], sizes = [8, 32], strides = [1, 1]} : vector<512x32xf32> to vector<8x32xf32>
    %57 = vector.extract_strided_slice %7 {offsets = [248, 0], sizes = [8, 32], strides = [1, 1]} : vector<512x32xf32> to vector<8x32xf32>
    %58 = tpu.concatenate %42, %43, %44, %45, %46, %47, %48, %49, %50, %51, %52, %53, %54, %55, %56, %57 in 1 : vector<8x32xf32>, vector<8x32xf32>, vector<8x32xf32>, vector<8x32xf32>, vector<8x32xf32>, vector<8x32xf32>, vector<8x32xf32>, vector<8x32xf32>, vector<8x32xf32>, vector<8x32xf32>, vector<8x32xf32>, vector<8x32xf32>, vector<8x32xf32>, vector<8x32xf32>, vector<8x32xf32>, vector<8x32xf32> -> vector<8x512xf32>
    %59 = vector.extract_strided_slice %7 {offsets = [128, 0], sizes = [8, 32], strides = [1, 1]} : vector<512x32xf32> to vector<8x32xf32>
    %60 = vector.extract_strided_slice %7 {offsets = [136, 0], sizes = [8, 32], strides = [1, 1]} : vector<512x32xf32> to vector<8x32xf32>
    %61 = vector.extract_strided_slice %7 {offsets = [144, 0], sizes = [8, 32], strides = [1, 1]} : vector<512x32xf32> to vector<8x32xf32>
    %62 = vector.extract_strided_slice %7 {offsets = [152, 0], sizes = [8, 32], strides = [1, 1]} : vector<512x32xf32> to vector<8x32xf32>
    %63 = vector.extract_strided_slice %7 {offsets = [192, 0], sizes = [8, 32], strides = [1, 1]} : vector<512x32xf32> to vector<8x32xf32>
    %64 = vector.extract_strided_slice %7 {offsets = [200, 0], sizes = [8, 32], strides = [1, 1]} : vector<512x32xf32> to vector<8x32xf32>
    %65 = vector.extract_strided_slice %7 {offsets = [208, 0], sizes = [8, 32], strides = [1, 1]} : vector<512x32xf32> to vector<8x32xf32>
    %66 = vector.extract_strided_slice %7 {offsets = [216, 0], sizes = [8, 32], strides = [1, 1]} : vector<512x32xf32> to vector<8x32xf32>
    %67 = vector.extract_strided_slice %7 {offsets = [256, 0], sizes = [8, 32], strides = [1, 1]} : vector<512x32xf32> to vector<8x32xf32>
    %68 = vector.extract_strided_slice %7 {offsets = [264, 0], sizes = [8, 32], strides = [1, 1]} : vector<512x32xf32> to vector<8x32xf32>
    %69 = vector.extract_strided_slice %7 {offsets = [272, 0], sizes = [8, 32], strides = [1, 1]} : vector<512x32xf32> to vector<8x32xf32>
    %70 = vector.extract_strided_slice %7 {offsets = [280, 0], sizes = [8, 32], strides = [1, 1]} : vector<512x32xf32> to vector<8x32xf32>
    %71 = vector.extract_strided_slice %7 {offsets = [320, 0], sizes = [8, 32], strides = [1, 1]} : vector<512x32xf32> to vector<8x32xf32>
    %72 = vector.extract_strided_slice %7 {offsets = [328, 0], sizes = [8, 32], strides = [1, 1]} : vector<512x32xf32> to vector<8x32xf32>
    %73 = vector.extract_strided_slice %7 {offsets = [336, 0], sizes = [8, 32], strides = [1, 1]} : vector<512x32xf32> to vector<8x32xf32>
    %74 = vector.extract_strided_slice %7 {offsets = [344, 0], sizes = [8, 32], strides = [1, 1]} : vector<512x32xf32> to vector<8x32xf32>
    %75 = tpu.concatenate %59, %60, %61, %62, %63, %64, %65, %66, %67, %68, %69, %70, %71, %72, %73, %74 in 1 : vector<8x32xf32>, vector<8x32xf32>, vector<8x32xf32>, vector<8x32xf32>, vector<8x32xf32>, vector<8x32xf32>, vector<8x32xf32>, vector<8x32xf32>, vector<8x32xf32>, vector<8x32xf32>, vector<8x32xf32>, vector<8x32xf32>, vector<8x32xf32>, vector<8x32xf32>, vector<8x32xf32>, vector<8x32xf32> -> vector<8x512xf32>
    %76 = vector.extract_strided_slice %7 {offsets = [144, 0], sizes = [8, 32], strides = [1, 1]} : vector<512x32xf32> to vector<8x32xf32>
    %77 = vector.extract_strided_slice %7 {offsets = [152, 0], sizes = [8, 32], strides = [1, 1]} : vector<512x32xf32> to vector<8x32xf32>
    %78 = vector.extract_strided_slice %7 {offsets = [160, 0], sizes = [8, 32], strides = [1, 1]} : vector<512x32xf32> to vector<8x32xf32>
    %79 = vector.extract_strided_slice %7 {offsets = [168, 0], sizes = [8, 32], strides = [1, 1]} : vector<512x32xf32> to vector<8x32xf32>
    %80 = vector.extract_strided_slice %7 {offsets = [208, 0], sizes = [8, 32], strides = [1, 1]} : vector<512x32xf32> to vector<8x32xf32>
    %81 = vector.extract_strided_slice %7 {offsets = [216, 0], sizes = [8, 32], strides = [1, 1]} : vector<512x32xf32> to vector<8x32xf32>
    %82 = vector.extract_strided_slice %7 {offsets = [224, 0], sizes = [8, 32], strides = [1, 1]} : vector<512x32xf32> to vector<8x32xf32>
    %83 = vector.extract_strided_slice %7 {offsets = [232, 0], sizes = [8, 32], strides = [1, 1]} : vector<512x32xf32> to vector<8x32xf32>
    %84 = vector.extract_strided_slice %7 {offsets = [272, 0], sizes = [8, 32], strides = [1, 1]} : vector<512x32xf32> to vector<8x32xf32>
    %85 = vector.extract_strided_slice %7 {offsets = [280, 0], sizes = [8, 32], strides = [1, 1]} : vector<512x32xf32> to vector<8x32xf32>
    %86 = vector.extract_strided_slice %7 {offsets = [288, 0], sizes = [8, 32], strides = [1, 1]} : vector<512x32xf32> to vector<8x32xf32>
    %87 = vector.extract_strided_slice %7 {offsets = [296, 0], sizes = [8, 32], strides = [1, 1]} : vector<512x32xf32> to vector<8x32xf32>
    %88 = vector.extract_strided_slice %7 {offsets = [336, 0], sizes = [8, 32], strides = [1, 1]} : vector<512x32xf32> to vector<8x32xf32>
    %89 = vector.extract_strided_slice %7 {offsets = [344, 0], sizes = [8, 32], strides = [1, 1]} : vector<512x32xf32> to vector<8x32xf32>
    %90 = vector.extract_strided_slice %7 {offsets = [352, 0], sizes = [8, 32], strides = [1, 1]} : vector<512x32xf32> to vector<8x32xf32>
    %91 = vector.extract_strided_slice %7 {offsets = [360, 0], sizes = [8, 32], strides = [1, 1]} : vector<512x32xf32> to vector<8x32xf32>
    %92 = tpu.concatenate %76, %77, %78, %79, %80, %81, %82, %83, %84, %85, %86, %87, %88, %89, %90, %91 in 1 : vector<8x32xf32>, vector<8x32xf32>, vector<8x32xf32>, vector<8x32xf32>, vector<8x32xf32>, vector<8x32xf32>, vector<8x32xf32>, vector<8x32xf32>, vector<8x32xf32>, vector<8x32xf32>, vector<8x32xf32>, vector<8x32xf32>, vector<8x32xf32>, vector<8x32xf32>, vector<8x32xf32>, vector<8x32xf32> -> vector<8x512xf32>
    %93 = vector.extract_strided_slice %7 {offsets = [160, 0], sizes = [8, 32], strides = [1, 1]} : vector<512x32xf32> to vector<8x32xf32>
    %94 = vector.extract_strided_slice %7 {offsets = [168, 0], sizes = [8, 32], strides = [1, 1]} : vector<512x32xf32> to vector<8x32xf32>
    %95 = vector.extract_strided_slice %7 {offsets = [176, 0], sizes = [8, 32], strides = [1, 1]} : vector<512x32xf32> to vector<8x32xf32>
    %96 = vector.extract_strided_slice %7 {offsets = [184, 0], sizes = [8, 32], strides = [1, 1]} : vector<512x32xf32> to vector<8x32xf32>
    %97 = vector.extract_strided_slice %7 {offsets = [224, 0], sizes = [8, 32], strides = [1, 1]} : vector<512x32xf32> to vector<8x32xf32>
    %98 = vector.extract_strided_slice %7 {offsets = [232, 0], sizes = [8, 32], strides = [1, 1]} : vector<512x32xf32> to vector<8x32xf32>
    %99 = vector.extract_strided_slice %7 {offsets = [240, 0], sizes = [8, 32], strides = [1, 1]} : vector<512x32xf32> to vector<8x32xf32>
    %100 = vector.extract_strided_slice %7 {offsets = [248, 0], sizes = [8, 32], strides = [1, 1]} : vector<512x32xf32> to vector<8x32xf32>
    %101 = vector.extract_strided_slice %7 {offsets = [288, 0], sizes = [8, 32], strides = [1, 1]} : vector<512x32xf32> to vector<8x32xf32>
    %102 = vector.extract_strided_slice %7 {offsets = [296, 0], sizes = [8, 32], strides = [1, 1]} : vector<512x32xf32> to vector<8x32xf32>
    %103 = vector.extract_strided_slice %7 {offsets = [304, 0], sizes = [8, 32], strides = [1, 1]} : vector<512x32xf32> to vector<8x32xf32>
    %104 = vector.extract_strided_slice %7 {offsets = [312, 0], sizes = [8, 32], strides = [1, 1]} : vector<512x32xf32> to vector<8x32xf32>
    %105 = vector.extract_strided_slice %7 {offsets = [352, 0], sizes = [8, 32], strides = [1, 1]} : vector<512x32xf32> to vector<8x32xf32>
    %106 = vector.extract_strided_slice %7 {offsets = [360, 0], sizes = [8, 32], strides = [1, 1]} : vector<512x32xf32> to vector<8x32xf32>
    %107 = vector.extract_strided_slice %7 {offsets = [368, 0], sizes = [8, 32], strides = [1, 1]} : vector<512x32xf32> to vector<8x32xf32>
    %108 = vector.extract_strided_slice %7 {offsets = [376, 0], sizes = [8, 32], strides = [1, 1]} : vector<512x32xf32> to vector<8x32xf32>
    %109 = tpu.concatenate %93, %94, %95, %96, %97, %98, %99, %100, %101, %102, %103, %104, %105, %106, %107, %108 in 1 : vector<8x32xf32>, vector<8x32xf32>, vector<8x32xf32>, vector<8x32xf32>, vector<8x32xf32>, vector<8x32xf32>, vector<8x32xf32>, vector<8x32xf32>, vector<8x32xf32>, vector<8x32xf32>, vector<8x32xf32>, vector<8x32xf32>, vector<8x32xf32>, vector<8x32xf32>, vector<8x32xf32>, vector<8x32xf32> -> vector<8x512xf32>
    %110 = vector.extract_strided_slice %7 {offsets = [256, 0], sizes = [8, 32], strides = [1, 1]} : vector<512x32xf32> to vector<8x32xf32>
    %111 = vector.extract_strided_slice %7 {offsets = [264, 0], sizes = [8, 32], strides = [1, 1]} : vector<512x32xf32> to vector<8x32xf32>
    %112 = vector.extract_strided_slice %7 {offsets = [272, 0], sizes = [8, 32], strides = [1, 1]} : vector<512x32xf32> to vector<8x32xf32>
    %113 = vector.extract_strided_slice %7 {offsets = [280, 0], sizes = [8, 32], strides = [1, 1]} : vector<512x32xf32> to vector<8x32xf32>
    %114 = vector.extract_strided_slice %7 {offsets = [320, 0], sizes = [8, 32], strides = [1, 1]} : vector<512x32xf32> to vector<8x32xf32>
    %115 = vector.extract_strided_slice %7 {offsets = [328, 0], sizes = [8, 32], strides = [1, 1]} : vector<512x32xf32> to vector<8x32xf32>
    %116 = vector.extract_strided_slice %7 {offsets = [336, 0], sizes = [8, 32], strides = [1, 1]} : vector<512x32xf32> to vector<8x32xf32>
    %117 = vector.extract_strided_slice %7 {offsets = [344, 0], sizes = [8, 32], strides = [1, 1]} : vector<512x32xf32> to vector<8x32xf32>
    %118 = vector.extract_strided_slice %7 {offsets = [384, 0], sizes = [8, 32], strides = [1, 1]} : vector<512x32xf32> to vector<8x32xf32>
    %119 = vector.extract_strided_slice %7 {offsets = [392, 0], sizes = [8, 32], strides = [1, 1]} : vector<512x32xf32> to vector<8x32xf32>
    %120 = vector.extract_strided_slice %7 {offsets = [400, 0], sizes = [8, 32], strides = [1, 1]} : vector<512x32xf32> to vector<8x32xf32>
    %121 = vector.extract_strided_slice %7 {offsets = [408, 0], sizes = [8, 32], strides = [1, 1]} : vector<512x32xf32> to vector<8x32xf32>
    %122 = vector.extract_strided_slice %7 {offsets = [448, 0], sizes = [8, 32], strides = [1, 1]} : vector<512x32xf32> to vector<8x32xf32>
    %123 = vector.extract_strided_slice %7 {offsets = [456, 0], sizes = [8, 32], strides = [1, 1]} : vector<512x32xf32> to vector<8x32xf32>
    %124 = vector.extract_strided_slice %7 {offsets = [464, 0], sizes = [8, 32], strides = [1, 1]} : vector<512x32xf32> to vector<8x32xf32>
    %125 = vector.extract_strided_slice %7 {offsets = [472, 0], sizes = [8, 32], strides = [1, 1]} : vector<512x32xf32> to vector<8x32xf32>
    %126 = tpu.concatenate %110, %111, %112, %113, %114, %115, %116, %117, %118, %119, %120, %121, %122, %123, %124, %125 in 1 : vector<8x32xf32>, vector<8x32xf32>, vector<8x32xf32>, vector<8x32xf32>, vector<8x32xf32>, vector<8x32xf32>, vector<8x32xf32>, vector<8x32xf32>, vector<8x32xf32>, vector<8x32xf32>, vector<8x32xf32>, vector<8x32xf32>, vector<8x32xf32>, vector<8x32xf32>, vector<8x32xf32>, vector<8x32xf32> -> vector<8x512xf32>
    %127 = vector.extract_strided_slice %7 {offsets = [272, 0], sizes = [8, 32], strides = [1, 1]} : vector<512x32xf32> to vector<8x32xf32>
    %128 = vector.extract_strided_slice %7 {offsets = [280, 0], sizes = [8, 32], strides = [1, 1]} : vector<512x32xf32> to vector<8x32xf32>
    %129 = vector.extract_strided_slice %7 {offsets = [288, 0], sizes = [8, 32], strides = [1, 1]} : vector<512x32xf32> to vector<8x32xf32>
    %130 = vector.extract_strided_slice %7 {offsets = [296, 0], sizes = [8, 32], strides = [1, 1]} : vector<512x32xf32> to vector<8x32xf32>
    %131 = vector.extract_strided_slice %7 {offsets = [336, 0], sizes = [8, 32], strides = [1, 1]} : vector<512x32xf32> to vector<8x32xf32>
    %132 = vector.extract_strided_slice %7 {offsets = [344, 0], sizes = [8, 32], strides = [1, 1]} : vector<512x32xf32> to vector<8x32xf32>
    %133 = vector.extract_strided_slice %7 {offsets = [352, 0], sizes = [8, 32], strides = [1, 1]} : vector<512x32xf32> to vector<8x32xf32>
    %134 = vector.extract_strided_slice %7 {offsets = [360, 0], sizes = [8, 32], strides = [1, 1]} : vector<512x32xf32> to vector<8x32xf32>
    %135 = vector.extract_strided_slice %7 {offsets = [400, 0], sizes = [8, 32], strides = [1, 1]} : vector<512x32xf32> to vector<8x32xf32>
    %136 = vector.extract_strided_slice %7 {offsets = [408, 0], sizes = [8, 32], strides = [1, 1]} : vector<512x32xf32> to vector<8x32xf32>
    %137 = vector.extract_strided_slice %7 {offsets = [416, 0], sizes = [8, 32], strides = [1, 1]} : vector<512x32xf32> to vector<8x32xf32>
    %138 = vector.extract_strided_slice %7 {offsets = [424, 0], sizes = [8, 32], strides = [1, 1]} : vector<512x32xf32> to vector<8x32xf32>
    %139 = vector.extract_strided_slice %7 {offsets = [464, 0], sizes = [8, 32], strides = [1, 1]} : vector<512x32xf32> to vector<8x32xf32>
    %140 = vector.extract_strided_slice %7 {offsets = [472, 0], sizes = [8, 32], strides = [1, 1]} : vector<512x32xf32> to vector<8x32xf32>
    %141 = vector.extract_strided_slice %7 {offsets = [480, 0], sizes = [8, 32], strides = [1, 1]} : vector<512x32xf32> to vector<8x32xf32>
    %142 = vector.extract_strided_slice %7 {offsets = [488, 0], sizes = [8, 32], strides = [1, 1]} : vector<512x32xf32> to vector<8x32xf32>
    %143 = tpu.concatenate %127, %128, %129, %130, %131, %132, %133, %134, %135, %136, %137, %138, %139, %140, %141, %142 in 1 : vector<8x32xf32>, vector<8x32xf32>, vector<8x32xf32>, vector<8x32xf32>, vector<8x32xf32>, vector<8x32xf32>, vector<8x32xf32>, vector<8x32xf32>, vector<8x32xf32>, vector<8x32xf32>, vector<8x32xf32>, vector<8x32xf32>, vector<8x32xf32>, vector<8x32xf32>, vector<8x32xf32>, vector<8x32xf32> -> vector<8x512xf32>
    %144 = vector.extract_strided_slice %7 {offsets = [288, 0], sizes = [8, 32], strides = [1, 1]} : vector<512x32xf32> to vector<8x32xf32>
    %145 = vector.extract_strided_slice %7 {offsets = [296, 0], sizes = [8, 32], strides = [1, 1]} : vector<512x32xf32> to vector<8x32xf32>
    %146 = vector.extract_strided_slice %7 {offsets = [304, 0], sizes = [8, 32], strides = [1, 1]} : vector<512x32xf32> to vector<8x32xf32>
    %147 = vector.extract_strided_slice %7 {offsets = [312, 0], sizes = [8, 32], strides = [1, 1]} : vector<512x32xf32> to vector<8x32xf32>
    %148 = vector.extract_strided_slice %7 {offsets = [352, 0], sizes = [8, 32], strides = [1, 1]} : vector<512x32xf32> to vector<8x32xf32>
    %149 = vector.extract_strided_slice %7 {offsets = [360, 0], sizes = [8, 32], strides = [1, 1]} : vector<512x32xf32> to vector<8x32xf32>
    %150 = vector.extract_strided_slice %7 {offsets = [368, 0], sizes = [8, 32], strides = [1, 1]} : vector<512x32xf32> to vector<8x32xf32>
    %151 = vector.extract_strided_slice %7 {offsets = [376, 0], sizes = [8, 32], strides = [1, 1]} : vector<512x32xf32> to vector<8x32xf32>
    %152 = vector.extract_strided_slice %7 {offsets = [416, 0], sizes = [8, 32], strides = [1, 1]} : vector<512x32xf32> to vector<8x32xf32>
    %153 = vector.extract_strided_slice %7 {offsets = [424, 0], sizes = [8, 32], strides = [1, 1]} : vector<512x32xf32> to vector<8x32xf32>
    %154 = vector.extract_strided_slice %7 {offsets = [432, 0], sizes = [8, 32], strides = [1, 1]} : vector<512x32xf32> to vector<8x32xf32>
    %155 = vector.extract_strided_slice %7 {offsets = [440, 0], sizes = [8, 32], strides = [1, 1]} : vector<512x32xf32> to vector<8x32xf32>
    %156 = vector.extract_strided_slice %7 {offsets = [480, 0], sizes = [8, 32], strides = [1, 1]} : vector<512x32xf32> to vector<8x32xf32>
    %157 = vector.extract_strided_slice %7 {offsets = [488, 0], sizes = [8, 32], strides = [1, 1]} : vector<512x32xf32> to vector<8x32xf32>
    %158 = vector.extract_strided_slice %7 {offsets = [496, 0], sizes = [8, 32], strides = [1, 1]} : vector<512x32xf32> to vector<8x32xf32>
    %159 = vector.extract_strided_slice %7 {offsets = [504, 0], sizes = [8, 32], strides = [1, 1]} : vector<512x32xf32> to vector<8x32xf32>
    %160 = tpu.concatenate %144, %145, %146, %147, %148, %149, %150, %151, %152, %153, %154, %155, %156, %157, %158, %159 in 1 : vector<8x32xf32>, vector<8x32xf32>, vector<8x32xf32>, vector<8x32xf32>, vector<8x32xf32>, vector<8x32xf32>, vector<8x32xf32>, vector<8x32xf32>, vector<8x32xf32>, vector<8x32xf32>, vector<8x32xf32>, vector<8x32xf32>, vector<8x32xf32>, vector<8x32xf32>, vector<8x32xf32>, vector<8x32xf32> -> vector<8x512xf32>
    %161 = tpu.concatenate %24, %41, %58, %75, %92, %109, %126, %143, %160 in 0 : vector<8x512xf32>, vector<8x512xf32>, vector<8x512xf32>, vector<8x512xf32>, vector<8x512xf32>, vector<8x512xf32>, vector<8x512xf32>, vector<8x512xf32>, vector<8x512xf32> -> vector<72x512xf32>
    %c0_6 = arith.constant 0 : index
    %c0_7 = arith.constant 0 : index
    %162 = vector.load %arg5[%c0_6, %c0_7] : memref<512x64xf32, #tpu.memory_space<vmem>>, vector<512x64xf32>
    %cst_8 = arith.constant dense<0.000000e+00> : vector<72x64xf32>
    %163 = tpu.matmul %161, %162, %cst_8 {dimension_numbers = #tpu.dot_dimension_numbers<[1], [0], [0], [1], [0, 0, 1, 1], [], []>} : vector<72x512xf32>, vector<512x64xf32>, vector<72x64xf32> -> vector<72x64xf32>
    %c0_9 = arith.constant 0 : index
    %c0_10 = arith.constant 0 : index
    %164 = vector.load %arg6[%c0_9, %c0_10] : memref<1x64xf32, #tpu.memory_space<vmem>>, vector<1x64xf32>
    %165 = vector.broadcast %164 : vector<1x64xf32> to vector<72x64xf32>
    %166 = arith.addf %163, %165 : vector<72x64xf32>
    %cst_11 = arith.constant 0.000000e+00 : f32
    %167 = vector.broadcast %cst_11 : f32 to vector<72x64xf32>
    %168 = arith.maximumf %166, %167 : vector<72x64xf32>
    %169 = vector.extract_strided_slice %168 {offsets = [0, 0], sizes = [8, 64], strides = [1, 1]} : vector<72x64xf32> to vector<8x64xf32>
    %170 = vector.extract_strided_slice %168 {offsets = [8, 0], sizes = [8, 64], strides = [1, 1]} : vector<72x64xf32> to vector<8x64xf32>
    %171 = vector.extract_strided_slice %168 {offsets = [16, 0], sizes = [8, 64], strides = [1, 1]} : vector<72x64xf32> to vector<8x64xf32>
    %172 = vector.extract_strided_slice %168 {offsets = [24, 0], sizes = [8, 64], strides = [1, 1]} : vector<72x64xf32> to vector<8x64xf32>
    %173 = vector.extract_strided_slice %168 {offsets = [32, 0], sizes = [8, 64], strides = [1, 1]} : vector<72x64xf32> to vector<8x64xf32>
    %174 = vector.extract_strided_slice %168 {offsets = [40, 0], sizes = [8, 64], strides = [1, 1]} : vector<72x64xf32> to vector<8x64xf32>
    %175 = vector.extract_strided_slice %168 {offsets = [48, 0], sizes = [8, 64], strides = [1, 1]} : vector<72x64xf32> to vector<8x64xf32>
    %176 = vector.extract_strided_slice %168 {offsets = [56, 0], sizes = [8, 64], strides = [1, 1]} : vector<72x64xf32> to vector<8x64xf32>
    %177 = vector.extract_strided_slice %168 {offsets = [64, 0], sizes = [8, 64], strides = [1, 1]} : vector<72x64xf32> to vector<8x64xf32>
    %178 = tpu.concatenate %169, %170, %171, %172, %173, %174, %175, %176, %177 in 1 : vector<8x64xf32>, vector<8x64xf32>, vector<8x64xf32>, vector<8x64xf32>, vector<8x64xf32>, vector<8x64xf32>, vector<8x64xf32>, vector<8x64xf32>, vector<8x64xf32> -> vector<8x576xf32>
    %c0_12 = arith.constant 0 : index
    %c0_13 = arith.constant 0 : index
    %179 = vector.load %arg7[%c0_12, %c0_13] : memref<576x64xf32, #tpu.memory_space<vmem>>, vector<576x64xf32>
    %cst_14 = arith.constant dense<0.000000e+00> : vector<8x64xf32>
    %180 = tpu.matmul %178, %179, %cst_14 {dimension_numbers = #tpu.dot_dimension_numbers<[1], [0], [0], [1], [0, 0, 1, 1], [], []>} : vector<8x576xf32>, vector<576x64xf32>, vector<8x64xf32> -> vector<8x64xf32>
    %c0_15 = arith.constant 0 : index
    %c0_16 = arith.constant 0 : index
    %181 = vector.load %arg8[%c0_15, %c0_16] : memref<1x64xf32, #tpu.memory_space<vmem>>, vector<1x64xf32>
    %182 = vector.broadcast %181 : vector<1x64xf32> to vector<8x64xf32>
    %183 = arith.addf %180, %182 : vector<8x64xf32>
    %cst_17 = arith.constant 0.000000e+00 : f32
    %184 = vector.broadcast %cst_17 : f32 to vector<8x64xf32>
    %185 = arith.maximumf %183, %184 : vector<8x64xf32>
    %c0_18 = arith.constant 0 : index
    %c0_19 = arith.constant 0 : index
    %186 = vector.load %arg2[%c0_18, %c0_19] : memref<8x8xf32, #tpu.memory_space<vmem>>, vector<8x8xf32>
    %c0_20 = arith.constant 0 : index
    %c0_21 = arith.constant 0 : index
    %187 = vector.load %arg9[%c0_20, %c0_21] : memref<8x64xf32, #tpu.memory_space<vmem>>, vector<8x64xf32>
    %cst_22 = arith.constant dense<0.000000e+00> : vector<8x64xf32>
    %188 = tpu.matmul %186, %187, %cst_22 {dimension_numbers = #tpu.dot_dimension_numbers<[1], [0], [0], [1], [0, 0, 1, 1], [], []>} : vector<8x8xf32>, vector<8x64xf32>, vector<8x64xf32> -> vector<8x64xf32>
    %c0_23 = arith.constant 0 : index
    %c0_24 = arith.constant 0 : index
    %189 = vector.load %arg10[%c0_23, %c0_24] : memref<1x64xf32, #tpu.memory_space<vmem>>, vector<1x64xf32>
    %190 = vector.broadcast %189 : vector<1x64xf32> to vector<8x64xf32>
    %191 = arith.addf %188, %190 : vector<8x64xf32>
    %cst_25 = arith.constant 0.000000e+00 : f32
    %192 = vector.broadcast %cst_25 : f32 to vector<8x64xf32>
    %193 = arith.maximumf %191, %192 : vector<8x64xf32>
    %c0_26 = arith.constant 0 : index
    %c0_27 = arith.constant 0 : index
    %194 = vector.load %arg11[%c0_26, %c0_27] : memref<64x64xf32, #tpu.memory_space<vmem>>, vector<64x64xf32>
    %cst_28 = arith.constant dense<0.000000e+00> : vector<8x64xf32>
    %195 = tpu.matmul %193, %194, %cst_28 {dimension_numbers = #tpu.dot_dimension_numbers<[1], [0], [0], [1], [0, 0, 1, 1], [], []>} : vector<8x64xf32>, vector<64x64xf32>, vector<8x64xf32> -> vector<8x64xf32>
    %c0_29 = arith.constant 0 : index
    %c0_30 = arith.constant 0 : index
    %196 = vector.load %arg12[%c0_29, %c0_30] : memref<1x64xf32, #tpu.memory_space<vmem>>, vector<1x64xf32>
    %197 = vector.broadcast %196 : vector<1x64xf32> to vector<8x64xf32>
    %198 = arith.addf %195, %197 : vector<8x64xf32>
    %cst_31 = arith.constant 0.000000e+00 : f32
    %199 = vector.broadcast %cst_31 : f32 to vector<8x64xf32>
    %200 = arith.maximumf %198, %199 : vector<8x64xf32>
    %201 = tpu.concatenate %185, %200 in 1 : vector<8x64xf32>, vector<8x64xf32> -> vector<8x128xf32>
    %c0_32 = arith.constant 0 : index
    %c0_33 = arith.constant 0 : index
    %202 = vector.load %arg13[%c0_32, %c0_33] : memref<8x128xf32, #tpu.memory_space<vmem>>, vector<8x128xf32>
    tpu.vector_store %arg13[%c0_32, %c0_33], %201 {strides = array<i32>} : memref<8x128xf32, #tpu.memory_space<vmem>>, vector<8x128xf32>,
    return
  }
  func.func @transform_0(%arg0: i32) -> (i32, i32) {
    %c0_i32 = arith.constant 0 : i32
    %c0_i32_0 = arith.constant 0 : i32
    return %arg0, %c0_i32 : i32, i32
  }
  func.func @transform_1(%arg0: i32) -> (i32, i32) {
    %c0_i32 = arith.constant 0 : i32
    %c0_i32_0 = arith.constant 0 : i32
    return %arg0, %c0_i32 : i32, i32
  }
  func.func @transform_2(%arg0: i32) -> (i32, i32) {
    %c0_i32 = arith.constant 0 : i32
    %c0_i32_0 = arith.constant 0 : i32
    %c0_i32_1 = arith.constant 0 : i32
    return %c0_i32, %c0_i32_0 : i32, i32
  }
  func.func @transform_3(%arg0: i32) -> (i32, i32) {
    %c0_i32 = arith.constant 0 : i32
    %c0_i32_0 = arith.constant 0 : i32
    %c0_i32_1 = arith.constant 0 : i32
    return %c0_i32, %c0_i32_0 : i32, i32
  }
  func.func @transform_4(%arg0: i32) -> (i32, i32) {
    %c0_i32 = arith.constant 0 : i32
    %c0_i32_0 = arith.constant 0 : i32
    %c0_i32_1 = arith.constant 0 : i32
    return %c0_i32, %c0_i32_0 : i32, i32
  }
  func.func @transform_5(%arg0: i32) -> (i32, i32) {
    %c0_i32 = arith.constant 0 : i32
    %c0_i32_0 = arith.constant 0 : i32
    %c0_i32_1 = arith.constant 0 : i32
    return %c0_i32, %c0_i32_0 : i32, i32
  }
  func.func @transform_6(%arg0: i32) -> (i32, i32) {
    %c0_i32 = arith.constant 0 : i32
    %c0_i32_0 = arith.constant 0 : i32
    %c0_i32_1 = arith.constant 0 : i32
    return %c0_i32, %c0_i32_0 : i32, i32
  }
  func.func @transform_7(%arg0: i32) -> (i32, i32) {
    %c0_i32 = arith.constant 0 : i32
    %c0_i32_0 = arith.constant 0 : i32
    %c0_i32_1 = arith.constant 0 : i32
    return %c0_i32, %c0_i32_0 : i32, i32
  }
  func.func @transform_8(%arg0: i32) -> (i32, i32) {
    %c0_i32 = arith.constant 0 : i32
    %c0_i32_0 = arith.constant 0 : i32
    %c0_i32_1 = arith.constant 0 : i32
    return %c0_i32, %c0_i32_0 : i32, i32
  }
  func.func @transform_9(%arg0: i32) -> (i32, i32) {
    %c0_i32 = arith.constant 0 : i32
    %c0_i32_0 = arith.constant 0 : i32
    %c0_i32_1 = arith.constant 0 : i32
    return %c0_i32, %c0_i32_0 : i32, i32
  }
  func.func @transform_10(%arg0: i32) -> (i32, i32) {
    %c0_i32 = arith.constant 0 : i32
    %c0_i32_0 = arith.constant 0 : i32
    %c0_i32_1 = arith.constant 0 : i32
    return %c0_i32, %c0_i32_0 : i32, i32
  }
  func.func @transform_11(%arg0: i32) -> (i32, i32) {
    %c0_i32 = arith.constant 0 : i32
    %c0_i32_0 = arith.constant 0 : i32
    %c0_i32_1 = arith.constant 0 : i32
    return %c0_i32, %c0_i32_0 : i32, i32
  }
  func.func @transform_12(%arg0: i32) -> (i32, i32) {
    %c0_i32 = arith.constant 0 : i32
    %c0_i32_0 = arith.constant 0 : i32
    return %arg0, %c0_i32 : i32, i32
  }
}

</mosaic_0001>

<bundles_post_ra>
// kernel: multi_forward.1
= control target key start
LH: loop header
LB: loop body
LE: loop exit
PB: predicated region body
PF: predicated region fallthrough
CT: control target
= control target key end

     0   :  { %v2488_v0 = vmov 0.0|0.0   ;;  %s2489_s26 = smov 32   ;;  %s2490_s27 = smov 64   ;;  %vm705_vm0 = vcmask 261120   ;;  %vm707_vm1 = vcmask 523264   ;;  %vm709_vm2 = vcmask 785408   ;;  %s3972_s2 = inlined_call_operand.vmem [shape: f32[256,32], index: 2, kind: input, shape index: {}]   ;;  %s3973_s0 = inlined_call_operand.vmem [shape: f32[512,256], index: 0, kind: input, shape index: {}]   ;;  %s3974_s4 = inlined_call_operand.vmem [shape: f32[512,64], index: 4, kind: input, shape index: {}]   ;;  %s3975_s3 = inlined_call_operand.vmem [shape: f32[1,32], index: 3, kind: input, shape index: {}]   ;;  %s3976_s6 = inlined_call_operand.vmem [shape: f32[576,64], index: 6, kind: input, shape index: {}]   ;;  %s3977_s5 = inlined_call_operand.vmem [shape: f32[1,64], index: 5, kind: input, shape index: {}]   ;;  %s3978_s8 = inlined_call_operand.vmem [shape: f32[8,64], index: 8, kind: input, shape index: {}]   ;;  %s3979_s1 = inlined_call_operand.vmem [shape: f32[8,8], index: 1, kind: input, shape index: {}]   ;;  %s3980_s10 = inlined_call_operand.vmem [shape: f32[64,64], index: 10, kind: input, shape index: {}]   ;;  %s3981_s7 = inlined_call_operand.vmem [shape: f32[1,64], index: 7, kind: input, shape index: {}]   ;;  %s3982_s9 = inlined_call_operand.vmem [shape: f32[1,64], index: 9, kind: input, shape index: {}]   ;;  %s3983_s11 = inlined_call_operand.vmem [shape: f32[1,64], index: 11, kind: input, shape index: {}]   ;;  %s3984_s12 = inlined_call_operand.vmem [shape: f32[8,128], index: 12, kind: output, shape index: {}]  }
   0x1   :  { %2059 = vmatprep.subr.bf16.mxu0 %v2488_v0  ;;  %v169_v1 = vld [vmem:[%s3972_s2] sm:$0xff]  ;;  %v170_v2 = vld [vmem:[%s3972_s2 + $0x8] sm:$0xff]  ;;  %v171_v3 = vld [vmem:[%s3972_s2 + $0x10] sm:$0xff]  ;;  %2259 = vmatprep.subr.bf16.mxu1 %v2488_v0  ;;  %s2491_s28 = smov 96   ;;  %vm2492_vm3 = vmmov 0   ;;  %vm1626_vm4 = vcmask 64512  }
   0x2   :  { %v2060_v4 = vpack.c.bf16 %v170_v2, %v169_v1  ;;  %v172_v5 = vld [vmem:[%s3972_s2 + $0x18] sm:$0xff]  ;;  %v173_v7 = vld [vmem:[%s3972_s2 + $0x20] sm:$0xff]  ;;  %v174_v8 = vld [vmem:[%s3972_s2 + $0x28] sm:$0xff] }
   0x3   :  { %v2063_v6 = vpack.c.bf16 %v172_v5, %v171_v3  ;;  %v2066_v9 = vpack.c.bf16 %v174_v8, %v173_v7  ;;  %v175_v10 = vld [vmem:[%s3972_s2 + $0x30] sm:$0xff]  ;;  %v176_v11 = vld [vmem:[%s3972_s2 + $0x38] sm:$0xff]  ;;  %v42_v12 = vld [vmem:[%s3973_s0 + $0x8] sm:$0xff] }
   0x4   :  { %2061 = vmatpush1.bf16.msra.mxu0 %v2060_v4  ;;  %2275 = vmatpush1.bf16.msra.mxu1 %v2060_v4  ;;  %v2069_v13 = vpack.c.bf16 %v176_v11, %v175_v10  ;;  %v177_v14 = vld [vmem:[%s3972_s2 + $0x40] sm:$0xff]  ;;  %v178_v15 = vld [vmem:[%s3972_s2 + $0x48] sm:$0xff]  ;;  %v179_v17 = vld [vmem:[%s3972_s2 + $0x50] sm:$0xff] }
   0x5   :  { %2062 = vmatprep.subr.bf16.mxu0 %v2488_v0  ;;  %2260 = vmatprep.subr.bf16.mxu1 %v2488_v0  ;;  %v2072_v16 = vpack.c.bf16 %v178_v15, %v177_v14  ;;  %v180_v18 = vld [vmem:[%s3972_s2 + $0x58] sm:$0xff]  ;;  %v181_v20 = vld [vmem:[%s3972_s2 + $0x60] sm:$0xff]  ;;  %v182_v21 = vld [vmem:[%s3972_s2 + $0x68] sm:$0xff] }
   0x6   :  { %272 = vmatprep.mubr.f32.mxu0 %v42_v12  ;;  %v2075_v19 = vpack.c.bf16 %v180_v18, %v179_v17  ;;  %v2078_v22 = vpack.c.bf16 %v182_v21, %v181_v20  ;;  %v183_v23 = vld [vmem:[%s3972_s2 + $0x70] sm:$0xff]  ;;  %v184_v24 = vld [vmem:[%s3972_s2 + $0x78] sm:$0xff]  ;;  %v185_v26 = vld [vmem:[%s3972_s2 + $0x80] sm:$0xff] }
   0x7   :  { %v2081_v25 = vpack.c.bf16 %v184_v24, %v183_v23  ;;  %v186_v27 = vld [vmem:[%s3972_s2 + $0x88] sm:$0xff]  ;;  %v187_v29 = vld [vmem:[%s3972_s2 + $0x90] sm:$0xff]  ;;  %v188_v30 = vld [vmem:[%s3972_s2 + $0x98] sm:$0xff] }
   0x8   :  { %2064 = vmatpush1.bf16.msra.mxu0 %v2063_v6  ;;  %2276 = vmatpush1.bf16.msra.mxu1 %v2063_v6  ;;  %v2084_v28 = vpack.c.bf16 %v186_v27, %v185_v26  ;;  %v2087_v31 = vpack.c.bf16 %v188_v30, %v187_v29  ;;  %v189_v32 = vld [vmem:[%s3972_s2 + $0xa0] sm:$0xff]  ;;  %v190_v33 = vld [vmem:[%s3972_s2 + $0xa8] sm:$0xff]  ;;  %v191_v35 = vld [vmem:[%s3972_s2 + $0xb0] sm:$0xff] }
   0x9   :  { %2065 = vmatprep.subr.bf16.mxu0 %v2488_v0  ;;  %2261 = vmatprep.subr.bf16.mxu1 %v2488_v0  ;;  %v2090_v34 = vpack.c.bf16 %v190_v33, %v189_v32  ;;  %v192_v36 = vld [vmem:[%s3972_s2 + $0xb8] sm:$0xff]  ;;  %v193_v38 = vld [vmem:[%s3972_s2 + $0xc0] sm:$0xff]  ;;  %v194_v39 = vld [vmem:[%s3972_s2 + $0xc8] sm:$0xff] }
   0xa   :  { %v2093_v37 = vpack.c.bf16 %v192_v36, %v191_v35  ;;  %v2096_v40 = vpack.c.bf16 %v194_v39, %v193_v38  ;;  %v195_v41 = vld [vmem:[%s3972_s2 + $0xd0] sm:$0xff]  ;;  %v196_v42 = vld [vmem:[%s3972_s2 + $0xd8] sm:$0xff]  ;;  %v197_v44 = vld [vmem:[%s3972_s2 + $0xe0] sm:$0xff] }
   0xb   :  { %v2099_v43 = vpack.c.bf16 %v196_v42, %v195_v41  ;;  %v198_v45 = vld [vmem:[%s3972_s2 + $0xe8] sm:$0xff]  ;;  %v199_v47 = vld [vmem:[%s3972_s2 + $0xf0] sm:$0xff]  ;;  %v200_v48 = vld [vmem:[%s3972_s2 + $0xf8] sm:$0xff] }
   0xc   :  { %2067 = vmatpush1.bf16.msra.mxu0 %v2066_v9  ;;  %2277 = vmatpush1.bf16.msra.mxu1 %v2066_v9  ;;  %v2102_v46 = vpack.c.bf16 %v198_v45, %v197_v44  ;;  %v2105_v49 = vpack.c.bf16 %v200_v48, %v199_v47  ;;  %v41_v50 = vld [vmem:[%s3973_s0] sm:$0xff]  ;;  %v44_v51 = vld [vmem:[%s3973_s0 + $0x18] sm:$0xff]  ;;  %v43_v52 = vld [vmem:[%s3973_s0 + $0x10] sm:$0xff] }
   0xd   :  { %2068 = vmatprep.subr.bf16.mxu0 %v2488_v0  ;;  %2262 = vmatprep.subr.bf16.mxu1 %v2488_v0  ;;  %v46_v53 = vld [vmem:[%s3973_s0 + $0x28] sm:$0xff]  ;;  %v45_v54 = vld [vmem:[%s3973_s0 + $0x20] sm:$0xff]  ;;  %v48_v55 = vld [vmem:[%s3973_s0 + $0x38] sm:$0xff] }
   0xe   :  { %v47_v56 = vld [vmem:[%s3973_s0 + $0x30] sm:$0xff]  ;;  %v50_v57 = vld [vmem:[%s3973_s0 + $0x48] sm:$0xff]  ;;  %v49_v58 = vld [vmem:[%s3973_s0 + $0x40] sm:$0xff] }
   0xf   :  { %v52_v59 = vld [vmem:[%s3973_s0 + $0x58] sm:$0xff]  ;;  %v51_v60 = vld [vmem:[%s3973_s0 + $0x50] sm:$0xff]  ;;  %v54_v61 = vld [vmem:[%s3973_s0 + $0x68] sm:$0xff] }
  0x10   :  { %2070 = vmatpush1.bf16.msra.mxu0 %v2069_v13  ;;  %2278 = vmatpush1.bf16.msra.mxu1 %v2069_v13  ;;  %v53_v62 = vld [vmem:[%s3973_s0 + $0x60] sm:$0xff]  ;;  %v56_v63 = vld [vmem:[%s3973_s0 + $0x78] sm:$0xff]  ;;  %v55_v1 = vld [vmem:[%s3973_s0 + $0x70] sm:$0xff] }
  0x11   :  { %2071 = vmatprep.subr.bf16.mxu0 %v2488_v0  ;;  %2263 = vmatprep.subr.bf16.mxu1 %v2488_v0  ;;  %v58_v2 = vld [vmem:[%s3973_s0 + $0x88] sm:$0xff]  ;;  %v57_v3 = vld [vmem:[%s3973_s0 + $0x80] sm:$0xff]  ;;  %v60_v5 = vld [vmem:[%s3973_s0 + $0x98] sm:$0xff] }
  0x12   :  { %v142_v4 = vld [vmem:[%s3973_s0 + $0x328] sm:$0xff]  ;;  %v141_v6 = vld [vmem:[%s3973_s0 + $0x320] sm:$0xff]  ;;  %v59_v7 = vld [vmem:[%s3973_s0 + $0x90] sm:$0xff] }
  0x13   :  { %522 = vmatprep.mubr.f32.mxu1 %v142_v4  ;;  %v144_v8 = vld [vmem:[%s3973_s0 + $0x338] sm:$0xff]  ;;  %v62_v9 = vld [vmem:[%s3973_s0 + $0xa8] sm:$0xff]  ;;  %v143_v10 = vld [vmem:[%s3973_s0 + $0x330] sm:$0xff] }
  0x14   :  { %2073 = vmatpush1.bf16.msra.mxu0 %v2072_v16  ;;  %2279 = vmatpush1.bf16.msra.mxu1 %v2072_v16  ;;  %v61_v11 = vld [vmem:[%s3973_s0 + $0xa0] sm:$0xff]  ;;  %v146_v12 = vld [vmem:[%s3973_s0 + $0x348] sm:$0xff]  ;;  %v64_v13 = vld [vmem:[%s3973_s0 + $0xb8] sm:$0xff] }
  0x15   :  { %2074 = vmatprep.subr.bf16.mxu0 %v2488_v0  ;;  %2264 = vmatprep.subr.bf16.mxu1 %v2488_v0  ;;  %v145_v14 = vld [vmem:[%s3973_s0 + $0x340] sm:$0xff]  ;;  %v63_v15 = vld [vmem:[%s3973_s0 + $0xb0] sm:$0xff]  ;;  %v148_v16 = vld [vmem:[%s3973_s0 + $0x358] sm:$0xff] }
  0x16   :  { %v66_v17 = vld [vmem:[%s3973_s0 + $0xc8] sm:$0xff]  ;;  %v147_v18 = vld [vmem:[%s3973_s0 + $0x350] sm:$0xff]  ;;  %v68_v21 = vld [vmem:[%s3973_s0 + $0xd8] sm:$0xff] }
  0x17   :  { %v150_v20 = vld [vmem:[%s3973_s0 + $0x368] sm:$0xff]  ;;  %v67_v23 = vld [vmem:[%s3973_s0 + $0xd0] sm:$0xff]  ;;  %v152_v24 = vld [vmem:[%s3973_s0 + $0x378] sm:$0xff] }
  0x18   :  { %2076 = vmatpush1.bf16.msra.mxu0 %v2075_v19  ;;  %2280 = vmatpush1.bf16.msra.mxu1 %v2075_v19  ;;  %v65_v19 = vld [vmem:[%s3973_s0 + $0xc0] sm:$0xff]  ;;  %v151_v26 = vld [vmem:[%s3973_s0 + $0x370] sm:$0xff]  ;;  %v72_v29 = vld [vmem:[%s3973_s0 + $0xf8] sm:$0xff] }
  0x19   :  { %2077 = vmatprep.subr.bf16.mxu0 %v2488_v0  ;;  %2265 = vmatprep.subr.bf16.mxu1 %v2488_v0  ;;  %v69_v27 = vld [vmem:[%s3973_s0 + $0xe0] sm:$0xff]  ;;  %v156_v32 = vld [vmem:[%s3973_s0 + $0x398] sm:$0xff]  ;;  %v74_v33 = vld [vmem:[%s3973_s0 + $0x108] sm:$0xff] }
  0x1a   :  { %v153_v30 = vld [vmem:[%s3973_s0 + $0x380] sm:$0xff]  ;;  %v158_v36 = vld [vmem:[%s3973_s0 + $0x3a8] sm:$0xff]  ;;  %v75_v39 = vld [vmem:[%s3973_s0 + $0x110] sm:$0xff] }
  0x1b   :  { %v73_v35 = vld [vmem:[%s3973_s0 + $0x100] sm:$0xff]  ;;  %v78_v41 = vld [vmem:[%s3973_s0 + $0x128] sm:$0xff]  ;;  %v159_v42 = vld [vmem:[%s3973_s0 + $0x3b0] sm:$0xff] }
  0x1c   :  { %2079 = vmatpush1.bf16.msra.mxu0 %v2078_v22  ;;  %2281 = vmatpush1.bf16.msra.mxu1 %v2078_v22  ;;  %v149_v22 = vld [vmem:[%s3973_s0 + $0x360] sm:$0xff]  ;;  %v164_v47 = vld [vmem:[%s3973_s0 + $0x3d8] sm:$0xff]  ;;  %v79_v48 = vld [vmem:[%s3973_s0 + $0x130] sm:$0xff] }
  0x1d   :  { %2080 = vmatprep.subr.bf16.mxu0 %v2488_v0  ;;  %2266 = vmatprep.subr.bf16.mxu1 %v2488_v0  ;;  %v157_v38 = vld [vmem:[%s3973_s0 + $0x3a0] sm:$0xff] }
  0x1e   :  { %v77_v44 = vld [vmem:[%s3973_s0 + $0x120] sm:$0xff] }
  0x1f   :  { %v161_v45 = vld [vmem:[%s3973_s0 + $0x3c0] sm:$0xff] }
  0x20   :  { %2082 = vmatpush1.bf16.msra.mxu0 %v2081_v25  ;;  %2282 = vmatpush1.bf16.msra.mxu1 %v2081_v25  ;;  %v70_v25 = vld [vmem:[%s3973_s0 + $0xe8] sm:$0xff]  ;;  %v93_v4 = vld [vmem:[%s3973_s0 + $0x1a0] sm:$0xff] }
  0x21   :  { %2083 = vmatprep.subr.bf16.mxu0 %v2488_v0  ;;  %2267 = vmatprep.subr.bf16.mxu1 %v2488_v0 }
  0x24   :  { %2085 = vmatpush1.bf16.msra.mxu0 %v2084_v28  ;;  %2283 = vmatpush1.bf16.msra.mxu1 %v2084_v28  ;;  %v154_v28 = vld [vmem:[%s3973_s0 + $0x388] sm:$0xff] }
  0x25   :  { %2086 = vmatprep.subr.bf16.mxu0 %v2488_v0  ;;  %2268 = vmatprep.subr.bf16.mxu1 %v2488_v0 }
  0x28   :  { %2088 = vmatpush1.bf16.msra.mxu0 %v2087_v31  ;;  %2284 = vmatpush1.bf16.msra.mxu1 %v2087_v31  ;;  %v71_v31 = vld [vmem:[%s3973_s0 + $0xf0] sm:$0xff] }
  0x29   :  { %2089 = vmatprep.subr.bf16.mxu0 %v2488_v0  ;;  %2269 = vmatprep.subr.bf16.mxu1 %v2488_v0 }
  0x2c   :  { %2091 = vmatpush1.bf16.msra.mxu0 %v2090_v34  ;;  %2285 = vmatpush1.bf16.msra.mxu1 %v2090_v34  ;;  %v155_v34 = vld [vmem:[%s3973_s0 + $0x390] sm:$0xff] }
  0x2d   :  { %2092 = vmatprep.subr.bf16.mxu0 %v2488_v0  ;;  %2270 = vmatprep.subr.bf16.mxu1 %v2488_v0 }
  0x30   :  { %2094 = vmatpush1.bf16.msra.mxu0 %v2093_v37  ;;  %2286 = vmatpush1.bf16.msra.mxu1 %v2093_v37  ;;  %v76_v37 = vld [vmem:[%s3973_s0 + $0x118] sm:$0xff] }
  0x31   :  { %2095 = vmatprep.subr.bf16.mxu0 %v2488_v0  ;;  %2271 = vmatprep.subr.bf16.mxu1 %v2488_v0 }
  0x34   :  { %2097 = vmatpush1.bf16.msra.mxu0 %v2096_v40  ;;  %2287 = vmatpush1.bf16.msra.mxu1 %v2096_v40  ;;  %v160_v40 = vld [vmem:[%s3973_s0 + $0x3b8] sm:$0xff] }
  0x35   :  { %2098 = vmatprep.subr.bf16.mxu0 %v2488_v0  ;;  %2272 = vmatprep.subr.bf16.mxu1 %v2488_v0 }
  0x38   :  { %2100 = vmatpush1.bf16.msra.mxu0 %v2099_v43  ;;  %2288 = vmatpush1.bf16.msra.mxu1 %v2099_v43  ;;  %v162_v43 = vld [vmem:[%s3973_s0 + $0x3c8] sm:$0xff] }
  0x39   :  { %2101 = vmatprep.subr.bf16.mxu0 %v2488_v0  ;;  %2273 = vmatprep.subr.bf16.mxu1 %v2488_v0 }
  0x3c   :  { %2103 = vmatpush1.bf16.msra.mxu0 %v2102_v46  ;;  %2289 = vmatpush1.bf16.msra.mxu1 %v2102_v46  ;;  %v80_v46 = vld [vmem:[%s3973_s0 + $0x138] sm:$0xff] }
  0x3d   :  { %2104 = vmatprep.subr.bf16.mxu0 %v2488_v0  ;;  %2274 = vmatprep.subr.bf16.mxu1 %v2488_v0 }
  0x40   :  { %2106 = vmatpush1.bf16.msra.mxu0 %v2105_v49  ;;  %2290 = vmatpush1.bf16.msra.mxu1 %v2105_v49  ;;  %v163_v49 = vld [vmem:[%s3973_s0 + $0x3d0] sm:$0xff] }
  0x43   :  { %273 = vmatmul.mubr.f32.vlgmr.msra.gmra.mrb[0].mxu0 %v41_v50  ;;  %523 = vmatmul.mubr.f32.vlgmr.msra.gmra.mrb[0].mxu1 %v141_v6  ;;  %v82_v50 = vld [vmem:[%s3973_s0 + $0x148] sm:$0xff]  ;;  %v95_v6 = vld [vmem:[%s3973_s0 + $0x1b0] sm:$0xff] }
  0x44   :  { %277 = vmatprep.mubr.f32.mxu0 %v44_v51  ;;  %527 = vmatprep.mubr.f32.mxu1 %v144_v8  ;;  %v166_v51 = vld [vmem:[%s3973_s0 + $0x3e8] sm:$0xff]  ;;  %v97_v8 = vld [vmem:[%s3973_s0 + $0x1c0] sm:$0xff] }
  0x47   :  { %278 = vmatmul.mubr.f32.gmra.mrb[2].mxu0 %v43_v52  ;;  %528 = vmatmul.mubr.f32.gmra.mrb[2].mxu1 %v143_v10  ;;  %v81_v52 = vld [vmem:[%s3973_s0 + $0x140] sm:$0xff]  ;;  %v99_v10 = vld [vmem:[%s3973_s0 + $0x1d0] sm:$0xff] }
  0x48   :  { %282 = vmatprep.mubr.f32.mxu0 %v46_v53  ;;  %532 = vmatprep.mubr.f32.mxu1 %v146_v12  ;;  %v165_v53 = vld [vmem:[%s3973_s0 + $0x3e0] sm:$0xff] }
  0x49   :  { %v101_v12 = vld [vmem:[%s3973_s0 + $0x1e0] sm:$0xff] }
  0x4b   :  { %283 = vmatmul.mubr.f32.gmra.mrb[4].mxu0 %v45_v54  ;;  %533 = vmatmul.mubr.f32.gmra.mrb[4].mxu1 %v145_v14  ;;  %v84_v54 = vld [vmem:[%s3973_s0 + $0x158] sm:$0xff]  ;;  %v103_v14 = vld [vmem:[%s3973_s0 + $0x1f0] sm:$0xff] }
  0x4c   :  { %287 = vmatprep.mubr.f32.mxu0 %v48_v55  ;;  %537 = vmatprep.mubr.f32.mxu1 %v148_v16  ;;  %v83_v55 = vld [vmem:[%s3973_s0 + $0x150] sm:$0xff]  ;;  %v105_v16 = vld [vmem:[%s3973_s0 + $0x200] sm:$0xff] }
  0x4f   :  { %288 = vmatmul.mubr.f32.gmra.mrb[6].mxu0 %v47_v56  ;;  %538 = vmatmul.mubr.f32.gmra.mrb[6].mxu1 %v147_v18  ;;  %v86_v56 = vld [vmem:[%s3973_s0 + $0x168] sm:$0xff]  ;;  %v107_v18 = vld [vmem:[%s3973_s0 + $0x210] sm:$0xff] }
  0x50   :  { %292 = vmatprep.mubr.f32.mxu0 %v50_v57  ;;  %542 = vmatprep.mubr.f32.mxu1 %v150_v20  ;;  %v168_v57 = vld [vmem:[%s3973_s0 + $0x3f8] sm:$0xff]  ;;  %v109_v20 = vld [vmem:[%s3973_s0 + $0x220] sm:$0xff] }
  0x53   :  { %293 = vmatmul.mubr.f32.gmra.mrb[8].mxu0 %v49_v58  ;;  %543 = vmatmul.mubr.f32.gmra.mrb[8].mxu1 %v149_v22  ;;  %v167_v58 = vld [vmem:[%s3973_s0 + $0x3f0] sm:$0xff] }
  0x54   :  { %297 = vmatprep.mubr.f32.mxu0 %v52_v59  ;;  %547 = vmatprep.mubr.f32.mxu1 %v152_v24  ;;  %v85_v59 = vld [vmem:[%s3973_s0 + $0x160] sm:$0xff]  ;;  %v111_v22 = vld [vmem:[%s3973_s0 + $0x230] sm:$0xff] }
  0x55   :  { %v113_v24 = vld [vmem:[%s3973_s0 + $0x240] sm:$0xff] }
  0x57   :  { %298 = vmatmul.mubr.f32.gmra.mrb[10].mxu0 %v51_v60  ;;  %548 = vmatmul.mubr.f32.gmra.mrb[10].mxu1 %v151_v26  ;;  %v88_v60 = vld [vmem:[%s3973_s0 + $0x178] sm:$0xff]  ;;  %v115_v26 = vld [vmem:[%s3973_s0 + $0x250] sm:$0xff] }
  0x58   :  { %302 = vmatprep.mubr.f32.mxu0 %v54_v61  ;;  %552 = vmatprep.mubr.f32.mxu1 %v154_v28  ;;  %v87_v61 = vld [vmem:[%s3973_s0 + $0x170] sm:$0xff]  ;;  %v117_v28 = vld [vmem:[%s3973_s0 + $0x260] sm:$0xff] }
  0x5b   :  { %303 = vmatmul.mubr.f32.gmra.mrb[12].mxu0 %v53_v62  ;;  %553 = vmatmul.mubr.f32.gmra.mrb[12].mxu1 %v153_v30  ;;  %v90_v62 = vld [vmem:[%s3973_s0 + $0x188] sm:$0xff]  ;;  %v119_v30 = vld [vmem:[%s3973_s0 + $0x270] sm:$0xff] }
  0x5c   :  { %307 = vmatprep.mubr.f32.mxu0 %v56_v63  ;;  %557 = vmatprep.mubr.f32.mxu1 %v156_v32  ;;  %v89_v63 = vld [vmem:[%s3973_s0 + $0x180] sm:$0xff] }
  0x5d   :  { %v121_v32 = vld [vmem:[%s3973_s0 + $0x280] sm:$0xff] }
  0x5f   :  { %308 = vmatmul.mubr.f32.gmra.mrb[14].mxu0 %v55_v1  ;;  %558 = vmatmul.mubr.f32.gmra.mrb[14].mxu1 %v155_v34  ;;  %v92_v1 = vld [vmem:[%s3973_s0 + $0x198] sm:$0xff]  ;;  %v123_v34 = vld [vmem:[%s3973_s0 + $0x290] sm:$0xff] }
  0x60   :  { %312 = vmatprep.mubr.f32.mxu0 %v58_v2  ;;  %562 = vmatprep.mubr.f32.mxu1 %v158_v36  ;;  %v91_v2 = vld [vmem:[%s3973_s0 + $0x190] sm:$0xff]  ;;  %v125_v36 = vld [vmem:[%s3973_s0 + $0x2a0] sm:$0xff] }
  0x63   :  { %313 = vmatmul.mubr.f32.gmra.mrb[16].mxu0 %v57_v3  ;;  %563 = vmatmul.mubr.f32.gmra.mrb[16].mxu1 %v157_v38  ;;  %v94_v3 = vld [vmem:[%s3973_s0 + $0x1a8] sm:$0xff]  ;;  %v127_v38 = vld [vmem:[%s3973_s0 + $0x2b0] sm:$0xff] }
  0x64   :  { %317 = vmatprep.mubr.f32.mxu0 %v60_v5  ;;  %567 = vmatprep.mubr.f32.mxu1 %v160_v40  ;;  %v96_v5 = vld [vmem:[%s3973_s0 + $0x1b8] sm:$0xff]  ;;  %v129_v40 = vld [vmem:[%s3973_s0 + $0x2c0] sm:$0xff] }
  0x67   :  { %318 = vmatmul.mubr.f32.gmra.mrb[18].mxu0 %v59_v7  ;;  %568 = vmatmul.mubr.f32.gmra.mrb[18].mxu1 %v159_v42  ;;  %v98_v7 = vld [vmem:[%s3973_s0 + $0x1c8] sm:$0xff]  ;;  %v131_v42 = vld [vmem:[%s3973_s0 + $0x2d0] sm:$0xff] }
  0x68   :  { %322 = vmatprep.mubr.f32.mxu0 %v62_v9  ;;  %572 = vmatprep.mubr.f32.mxu1 %v162_v43  ;;  %v100_v9 = vld [vmem:[%s3973_s0 + $0x1d8] sm:$0xff]  ;;  %v134_v43 = vld [vmem:[%s3973_s0 + $0x2e8] sm:$0xff] }
  0x6b   :  { %323 = vmatmul.mubr.f32.gmra.mrb[20].mxu0 %v61_v11  ;;  %573 = vmatmul.mubr.f32.gmra.mrb[20].mxu1 %v161_v45  ;;  %v102_v11 = vld [vmem:[%s3973_s0 + $0x1e8] sm:$0xff]  ;;  %v136_v45 = vld [vmem:[%s3973_s0 + $0x2f8] sm:$0xff] }
  0x6c   :  { %327 = vmatprep.mubr.f32.mxu0 %v64_v13  ;;  %577 = vmatprep.mubr.f32.mxu1 %v164_v47  ;;  %v104_v13 = vld [vmem:[%s3973_s0 + $0x1f8] sm:$0xff]  ;;  %v138_v47 = vld [vmem:[%s3973_s0 + $0x308] sm:$0xff] }
  0x6f   :  { %328 = vmatmul.mubr.f32.gmra.mrb[22].mxu0 %v63_v15  ;;  %578 = vmatmul.mubr.f32.gmra.mrb[22].mxu1 %v163_v49  ;;  %v106_v15 = vld [vmem:[%s3973_s0 + $0x208] sm:$0xff]  ;;  %v140_v49 = vld [vmem:[%s3973_s0 + $0x318] sm:$0xff] }
  0x70   :  { %332 = vmatprep.mubr.f32.mxu0 %v66_v17  ;;  %582 = vmatprep.mubr.f32.mxu1 %v166_v51  ;;  %v108_v17 = vld [vmem:[%s3973_s0 + $0x218] sm:$0xff] }
  0x73   :  { %333 = vmatmul.mubr.f32.gmra.mrb[24].mxu0 %v65_v19  ;;  %583 = vmatmul.mubr.f32.gmra.mrb[24].mxu1 %v165_v53  ;;  %v110_v19 = vld [vmem:[%s3973_s0 + $0x228] sm:$0xff] }
  0x74   :  { %337 = vmatprep.mubr.f32.mxu0 %v68_v21  ;;  %587 = vmatprep.mubr.f32.mxu1 %v168_v57  ;;  %v112_v21 = vld [vmem:[%s3973_s0 + $0x238] sm:$0xff] }
  0x77   :  { %338 = vmatmul.mubr.f32.gmra.mrb[26].mxu0 %v67_v23  ;;  %588 = vmatmul.mubr.f32.gmra.mrb[26].mxu1 %v167_v58  ;;  %v114_v23 = vld [vmem:[%s3973_s0 + $0x248] sm:$0xff] }
  0x78   :  { %342 = vmatprep.mubr.f32.mxu0 %v70_v25  ;;  %v116_v25 = vld [vmem:[%s3973_s0 + $0x258] sm:$0xff] }
  0x7b   :  { %343 = vmatmul.mubr.f32.gmra.mrb[28].mxu0 %v69_v27  ;;  %v118_v27 = vld [vmem:[%s3973_s0 + $0x268] sm:$0xff] }
  0x7c   :  { %347 = vmatprep.mubr.f32.mxu0 %v72_v29  ;;  %v120_v29 = vld [vmem:[%s3973_s0 + $0x278] sm:$0xff] }
  0x7f   :  { %348 = vmatmul.mubr.f32.gmra.mrb[30].mxu0 %v71_v31  ;;  %v122_v31 = vld [vmem:[%s3973_s0 + $0x288] sm:$0xff] }
  0x80   :  { %352 = vmatprep.mubr.f32.mxu0 %v74_v33  ;;  %v124_v33 = vld [vmem:[%s3973_s0 + $0x298] sm:$0xff] }
  0x83   :  { %353 = vmatmul.mubr.f32.gmra.mrb[32].mxu0 %v73_v35  ;;  %v126_v35 = vld [vmem:[%s3973_s0 + $0x2a8] sm:$0xff] }
  0x84   :  { %357 = vmatprep.mubr.f32.mxu0 %v76_v37  ;;  %v128_v37 = vld [vmem:[%s3973_s0 + $0x2b8] sm:$0xff] }
  0x87   :  { %358 = vmatmul.mubr.f32.gmra.mrb[34].mxu0 %v75_v39  ;;  %v130_v39 = vld [vmem:[%s3973_s0 + $0x2c8] sm:$0xff] }
  0x88   :  { %362 = vmatprep.mubr.f32.mxu0 %v78_v41  ;;  %v132_v41 = vld [vmem:[%s3973_s0 + $0x2d8] sm:$0xff] }
  0x8b   :  { %363 = vmatmul.mubr.f32.gmra.mrb[36].mxu0 %v77_v44  ;;  %v133_v44 = vld [vmem:[%s3973_s0 + $0x2e0] sm:$0xff] }
  0x8c   :  { %367 = vmatprep.mubr.f32.mxu0 %v80_v46  ;;  %v135_v46 = vld [vmem:[%s3973_s0 + $0x2f0] sm:$0xff] }
  0x8f   :  { %368 = vmatmul.mubr.f32.gmra.mrb[38].mxu0 %v79_v48  ;;  %v137_v48 = vld [vmem:[%s3973_s0 + $0x300] sm:$0xff] }
  0x90   :  { %372 = vmatprep.mubr.f32.mxu0 %v82_v50  ;;  %v139_v50 = vld [vmem:[%s3973_s0 + $0x310] sm:$0xff] }
  0x93   :  { %373 = vmatmul.mubr.f32.gmra.mrb[40].mxu0 %v81_v52 }
  0x94   :  { %377 = vmatprep.mubr.f32.mxu0 %v84_v54 }
  0x97   :  { %378 = vmatmul.mubr.f32.gmra.mrb[42].mxu0 %v83_v55  ;;  %v1020_v55 = vld [vmem:[%s3974_s4 + $0x80] sm:$0xff] }
  0x98   :  { %382 = vmatprep.mubr.f32.mxu0 %v86_v56  ;;  %v1021_v56 = vld [vmem:[%s3974_s4 + $0x88] sm:$0xff] }
  0x99   :  { %v2107_v58 = vpack.c.bf16 %v1021_v56, %v1020_v55  ;;  %v1018_v56 = vld [vmem:[%s3974_s4 + $0x70] sm:$0xff] }
  0x9b   :  { %383 = vmatmul.mubr.f32.gmra.mrb[44].mxu0 %v85_v59  ;;  %v1004_v59 = vld [vmem:[%s3974_s4] sm:$0xff]  ;;  %2108 = vmatprep.subr.bf16.mxu1 %v2107_v58  ;;  %v1019_v58 = vld [vmem:[%s3974_s4 + $0x78] sm:$0xff] }
  0x9c   :  { %387 = vmatprep.mubr.f32.mxu0 %v88_v60  ;;  %v1005_v60 = vld [vmem:[%s3974_s4 + $0x8] sm:$0xff] }
  0x9f   :  { %388 = vmatmul.mubr.f32.gmra.mrb[46].mxu0 %v87_v61 }
  0xa0   :  { %392 = vmatprep.mubr.f32.mxu0 %v90_v62  ;;  %v2109_v62 = vpack.c.bf16 %v1005_v60, %v1004_v59  ;;  %v2137_v60 = vpack.c.bf16 %v1019_v58, %v1018_v56 }
  0xa2   :  { %2110 = vmatpush3.bf16.msra.mxu1 %v2109_v62 }
  0xa3   :  { %393 = vmatmul.mubr.f32.gmra.mrb[48].mxu0 %v89_v63  ;;  %v1022_v63 = vld [vmem:[%s3974_s4 + $0x90] sm:$0xff] }
  0xa4   :  { %397 = vmatprep.mubr.f32.mxu0 %v92_v1  ;;  %v1023_v1 = vld [vmem:[%s3974_s4 + $0x98] sm:$0xff] }
  0xa7   :  { %398 = vmatmul.mubr.f32.gmra.mrb[50].mxu0 %v91_v2 }
  0xa8   :  { %402 = vmatprep.mubr.f32.mxu0 %v94_v3  ;;  %v2111_v3 = vpack.c.bf16 %v1023_v1, %v1022_v63 }
  0xaa   :  { %2112 = vmatprep.subr.bf16.mxu1 %v2111_v3 }
  0xab   :  { %403 = vmatmul.mubr.f32.gmra.mrb[52].mxu0 %v93_v4  ;;  %v1006_v4 = vld [vmem:[%s3974_s4 + $0x10] sm:$0xff] }
  0xac   :  { %407 = vmatprep.mubr.f32.mxu0 %v96_v5  ;;  %v1007_v5 = vld [vmem:[%s3974_s4 + $0x18] sm:$0xff] }
  0xaf   :  { %408 = vmatmul.mubr.f32.gmra.mrb[54].mxu0 %v95_v6 }
  0xb0   :  { %412 = vmatprep.mubr.f32.mxu0 %v98_v7  ;;  %v2113_v7 = vpack.c.bf16 %v1007_v5, %v1006_v4 }
  0xb2   :  { %2114 = vmatpush3.bf16.msra.mxu1 %v2113_v7 }
  0xb3   :  { %413 = vmatmul.mubr.f32.gmra.mrb[56].mxu0 %v97_v8  ;;  %v1024_v8 = vld [vmem:[%s3974_s4 + $0xa0] sm:$0xff] }
  0xb4   :  { %417 = vmatprep.mubr.f32.mxu0 %v100_v9  ;;  %v1025_v9 = vld [vmem:[%s3974_s4 + $0xa8] sm:$0xff] }
  0xb7   :  { %418 = vmatmul.mubr.f32.gmra.mrb[58].mxu0 %v99_v10 }
  0xb8   :  { %422 = vmatprep.mubr.f32.mxu0 %v102_v11  ;;  %v2115_v11 = vpack.c.bf16 %v1025_v9, %v1024_v8 }
  0xba   :  { %2116 = vmatprep.subr.bf16.mxu1 %v2115_v11 }
  0xbb   :  { %423 = vmatmul.mubr.f32.gmra.mrb[60].mxu0 %v101_v12  ;;  %v1008_v12 = vld [vmem:[%s3974_s4 + $0x20] sm:$0xff] }
  0xbc   :  { %427 = vmatprep.mubr.f32.mxu0 %v104_v13  ;;  %v1009_v13 = vld [vmem:[%s3974_s4 + $0x28] sm:$0xff] }
  0xbf   :  { %428 = vmatmul.mubr.f32.gmra.mrb[62].mxu0 %v103_v14 }
  0xc0   :  { %432 = vmatprep.mubr.f32.mxu0 %v106_v15  ;;  %v2117_v15 = vpack.c.bf16 %v1009_v13, %v1008_v12 }
  0xc2   :  { %2118 = vmatpush3.bf16.msra.mxu1 %v2117_v15 }
  0xc3   :  { %433 = vmatmul.mubr.f32.gmra.mrb[64].mxu0 %v105_v16  ;;  %v1026_v16 = vld [vmem:[%s3974_s4 + $0xb0] sm:$0xff] }
  0xc4   :  { %437 = vmatprep.mubr.f32.mxu0 %v108_v17  ;;  %v1027_v17 = vld [vmem:[%s3974_s4 + $0xb8] sm:$0xff] }
  0xc7   :  { %438 = vmatmul.mubr.f32.gmra.mrb[66].mxu0 %v107_v18 }
  0xc8   :  { %442 = vmatprep.mubr.f32.mxu0 %v110_v19  ;;  %v2119_v19 = vpack.c.bf16 %v1027_v17, %v1026_v16 }
  0xca   :  { %2120 = vmatprep.subr.bf16.mxu1 %v2119_v19 }
  0xcb   :  { %443 = vmatmul.mubr.f32.gmra.mrb[68].mxu0 %v109_v20  ;;  %v1010_v20 = vld [vmem:[%s3974_s4 + $0x30] sm:$0xff] }
  0xcc   :  { %447 = vmatprep.mubr.f32.mxu0 %v112_v21  ;;  %v1011_v21 = vld [vmem:[%s3974_s4 + $0x38] sm:$0xff] }
  0xcf   :  { %448 = vmatmul.mubr.f32.gmra.mrb[70].mxu0 %v111_v22 }
  0xd0   :  { %452 = vmatprep.mubr.f32.mxu0 %v114_v23  ;;  %v2121_v23 = vpack.c.bf16 %v1011_v21, %v1010_v20 }
  0xd2   :  { %2122 = vmatpush3.bf16.msra.mxu1 %v2121_v23 }
  0xd3   :  { %453 = vmatmul.mubr.f32.gmra.mrb[72].mxu0 %v113_v24  ;;  %v1028_v24 = vld [vmem:[%s3974_s4 + $0xc0] sm:$0xff] }
  0xd4   :  { %457 = vmatprep.mubr.f32.mxu0 %v116_v25  ;;  %v1029_v25 = vld [vmem:[%s3974_s4 + $0xc8] sm:$0xff] }
  0xd7   :  { %458 = vmatmul.mubr.f32.gmra.mrb[74].mxu0 %v115_v26 }
  0xd8   :  { %462 = vmatprep.mubr.f32.mxu0 %v118_v27  ;;  %v2123_v27 = vpack.c.bf16 %v1029_v25, %v1028_v24 }
  0xda   :  { %2124 = vmatprep.subr.bf16.mxu1 %v2123_v27 }
  0xdb   :  { %463 = vmatmul.mubr.f32.gmra.mrb[76].mxu0 %v117_v28  ;;  %v1012_v28 = vld [vmem:[%s3974_s4 + $0x40] sm:$0xff] }
  0xdc   :  { %467 = vmatprep.mubr.f32.mxu0 %v120_v29  ;;  %v1013_v29 = vld [vmem:[%s3974_s4 + $0x48] sm:$0xff] }
  0xdf   :  { %468 = vmatmul.mubr.f32.gmra.mrb[78].mxu0 %v119_v30 }
  0xe0   :  { %472 = vmatprep.mubr.f32.mxu0 %v122_v31  ;;  %v2125_v31 = vpack.c.bf16 %v1013_v29, %v1012_v28 }
  0xe2   :  { %2126 = vmatpush3.bf16.msra.mxu1 %v2125_v31 }
  0xe3   :  { %473 = vmatmul.mubr.f32.gmra.mrb[80].mxu0 %v121_v32  ;;  %v1030_v32 = vld [vmem:[%s3974_s4 + $0xd0] sm:$0xff] }
  0xe4   :  { %477 = vmatprep.mubr.f32.mxu0 %v124_v33  ;;  %v1031_v33 = vld [vmem:[%s3974_s4 + $0xd8] sm:$0xff] }
  0xe7   :  { %478 = vmatmul.mubr.f32.gmra.mrb[82].mxu0 %v123_v34 }
  0xe8   :  { %482 = vmatprep.mubr.f32.mxu0 %v126_v35  ;;  %v2127_v35 = vpack.c.bf16 %v1031_v33, %v1030_v32 }
  0xea   :  { %2128 = vmatprep.subr.bf16.mxu1 %v2127_v35 }
  0xeb   :  { %483 = vmatmul.mubr.f32.gmra.mrb[84].mxu0 %v125_v36  ;;  %v1014_v36 = vld [vmem:[%s3974_s4 + $0x50] sm:$0xff] }
  0xec   :  { %487 = vmatprep.mubr.f32.mxu0 %v128_v37  ;;  %v1015_v37 = vld [vmem:[%s3974_s4 + $0x58] sm:$0xff] }
  0xef   :  { %488 = vmatmul.mubr.f32.gmra.mrb[86].mxu0 %v127_v38 }
  0xf0   :  { %492 = vmatprep.mubr.f32.mxu0 %v130_v39  ;;  %v2129_v39 = vpack.c.bf16 %v1015_v37, %v1014_v36 }
  0xf2   :  { %2130 = vmatpush3.bf16.msra.mxu1 %v2129_v39 }
  0xf3   :  { %493 = vmatmul.mubr.f32.gmra.mrb[88].mxu0 %v129_v40  ;;  %v1032_v40 = vld [vmem:[%s3974_s4 + $0xe0] sm:$0xff] }
  0xf4   :  { %497 = vmatprep.mubr.f32.mxu0 %v132_v41  ;;  %v1033_v41 = vld [vmem:[%s3974_s4 + $0xe8] sm:$0xff] }
  0xf7   :  { %498 = vmatmul.mubr.f32.gmra.mrb[90].mxu0 %v131_v42 }
  0xf8   :  { %502 = vmatprep.mubr.f32.mxu0 %v134_v43  ;;  %v2131_v43 = vpack.c.bf16 %v1033_v41, %v1032_v40 }
  0xfa   :  { %2132 = vmatprep.subr.bf16.mxu1 %v2131_v43 }
  0xfb   :  { %503 = vmatmul.mubr.f32.gmra.mrb[92].mxu0 %v133_v44  ;;  %v1016_v44 = vld [vmem:[%s3974_s4 + $0x60] sm:$0xff] }
  0xfc   :  { %507 = vmatprep.mubr.f32.mxu0 %v136_v45  ;;  %v1017_v45 = vld [vmem:[%s3974_s4 + $0x68] sm:$0xff] }
  0xff   :  { %508 = vmatmul.mubr.f32.gmra.mrb[94].mxu0 %v135_v46 }
 0x100   :  { %512 = vmatprep.mubr.f32.mxu0 %v138_v47  ;;  %v2133_v47 = vpack.c.bf16 %v1017_v45, %v1016_v44 }
 0x102   :  { %2134 = vmatpush3.bf16.msra.mxu1 %v2133_v47 }
 0x103   :  { %513 = vmatmul.mubr.f32.gmra.mrb[96].mxu0 %v137_v48  ;;  %v3176_v48 = vld [vmem:[%s3975_s3] ss:$0 sm:$0xff] }
 0x104   :  { %517 = vmatprep.mubr.f32.mxu0 %v140_v49 }
 0x107   :  { %518 = vmatmul.mubr.f32.gmra.mrb[98].mxu0 %v139_v50  ;;  %v1034_v50 = vld [vmem:[%s3974_s4 + $0xf0] sm:$0xff] }
 0x116   :  { %v3071_v51 = vpop.f32.mrb[0].mxu0  ;;  %v3218_v20 = vpop.f32.mrb[0].mxu1 }
 0x117   :  { %v276_v52 = vpop.f32.mrb[1].mxu0  ;;  %v526_v21 = vpop.f32.mrb[1].mxu1 }
 0x118   :  { %v1035_v52 = vld [vmem:[%s3974_s4 + $0xf8] sm:$0xff] }
 0x119   :  { %v2135_v55 = vpack.c.bf16 %v1035_v52, %v1034_v50 }
 0x11a   :  { %v3073_v53 = vpop.f32.mrb[2].mxu0  ;;  %v529_v24 = vpop.f32.mrb[2].mxu1 }
 0x11b   :  { %v281_v54 = vpop.f32.mrb[3].mxu0  ;;  %v280_v49 = vadd.f32 %v3176_v48, %v3073_v53  ;;  %2136 = vmatprep.subr.bf16.mxu1 %v2135_v55  ;;  %v531_v27 = vpop.f32.mrb[3].mxu1 }
 0x11c   :  { %2138 = vmatpush3.bf16.msra.mxu1 %v2137_v60 }
 0x11e   :  { %v3081_v57 = vpop.f32.mrb[4].mxu0  ;;  %v3230_v31 = vpop.f32.mrb[4].mxu1 }
 0x11f   :  { %v286_v61 = vpop.f32.mrb[5].mxu0  ;;  %v3195_v62 = vadd.f32 %v3176_v48, %v3081_v57  ;;  %v536_v32 = vpop.f32.mrb[5].mxu1 }
 0x120   :  { %v594_v61 = vmax.f32 %v280_v49, 0.0 }
 0x122   :  { %v3095_v2 = vpop.f32.mrb[6].mxu0  ;;  %v539_v36 = vpop.f32.mrb[6].mxu1 }
 0x123   :  { %v291_v6 = vpop.f32.mrb[7].mxu0  ;;  %v290_v7 = vadd.f32 %v3176_v48, %v3095_v2 }
 0x124   :  { %v595_v6 = vmax.f32 %v3195_v62, 0.0  ;;  %v1041_v62 = vld [vmem:[%s3974_s4 + $0x128] sm:$0xff] }
 0x125   :  { %v596_v13 = vmax.f32 %v290_v7, 0.0 }
 0x126   :  { %v3109_v10 = vpop.f32.mrb[8].mxu0 }
 0x127   :  { %v296_v14 = vpop.f32.mrb[9].mxu0 }
 0x128   :  { %v3212_v14 = vadd.f32 %v3176_v48, %v3109_v10 }
 0x12a   :  { %v3123_v18 = vpop.f32.mrb[10].mxu0 }
 0x12b   :  { %v301_v22 = vpop.f32.mrb[11].mxu0  ;;  %v300_v23 = vadd.f32 %v3176_v48, %v3123_v18 }
 0x12c   :  { %v597_v22 = vmax.f32 %v3212_v14, 0.0 }
 0x12d   :  { %v598_v18 = vmax.f32 %v300_v23, 0.0 }
 0x12e   :  { %v3137_v26 = vpop.f32.mrb[12].mxu0 }
 0x12f   :  { %v306_v30 = vpop.f32.mrb[13].mxu0  ;;  %v305_v33 = vadd.f32 %v3176_v48, %v3137_v26 }
 0x131   :  { %v599_v45 = vmax.f32 %v305_v33, 0.0 }
 0x132   :  { %v3151_v34 = vpop.f32.mrb[14].mxu0 }
 0x133   :  { %v311_v38 = vpop.f32.mrb[15].mxu0 }
 0x134   :  { %v541_v38 = vpop.f32.mrb[7].mxu1 }
 0x135   :  { %v544_v43 = vpop.f32.mrb[8].mxu1 }
 0x136   :  { %v3165_v42 = vpop.f32.mrb[16].mxu0  ;;  %v546_v44 = vpop.f32.mrb[9].mxu1  ;;  %v545_v32 = vadd.f32 %v3176_v48, %v544_v43 }
 0x137   :  { %v316_v46 = vpop.f32.mrb[17].mxu0  ;;  %v549_v26 = vpop.f32.mrb[10].mxu1 }
 0x138   :  { %v310_v46 = vadd.f32 %v3176_v48, %v3151_v34  ;;  %v551_v50 = vpop.f32.mrb[11].mxu1  ;;  %v550_v38 = vadd.f32 %v3176_v48, %v549_v26 }
 0x139   :  { %v3242_v56 = vpop.f32.mrb[12].mxu1 }
 0x13a   :  { %v319_v54 = vpop.f32.mrb[18].mxu0  ;;  %v600_v58 = vmax.f32 %v310_v46, 0.0  ;;  %v648_v43 = vmax.f32 %v550_v38, 0.0 }
 0x13b   :  { %v320_v53 = vadd.f32 %v3176_v48, %v319_v54  ;;  %v321_v59 = vpop.f32.mrb[19].mxu0 }
 0x13c   :  { %v556_v59 = vpop.f32.mrb[13].mxu1 }
 0x13d   :  { %v602_v63 = vmax.f32 %v320_v53, 0.0  ;;  %v3247_v60 = vpop.f32.mrb[14].mxu1 }
 0x13e   :  { %v324_v1 = vpop.f32.mrb[20].mxu0 }
 0x13f   :  { %v3198_v3 = vadd.f32 %v3176_v48, %v324_v1  ;;  %v326_v4 = vpop.f32.mrb[21].mxu0  ;;  %v2297_v5 = vpack.i.bf16 %v594_v61, %v602_v63  ;;  %v561_v1 = vpop.f32.mrb[15].mxu1 }
 0x140   :  { %v3249_v4 = vpop.f32.mrb[16].mxu1 }
 0x141   :  { %v603_v8 = vmax.f32 %v3198_v3, 0.0  ;;  %2298 = vrot.lane.b32.xlu0 %v2297_v5, %s2489_s26  ;;  %v530_v5 = vadd.f32 %v3176_v48, %v529_v24  ;;  %v566_v7 = vpop.f32.mrb[17].mxu1  ;;  %v1040_v3 = vld [vmem:[%s3974_s4 + $0x120] sm:$0xff] }
 0x142   :  { %v329_v57 = vpop.f32.mrb[22].mxu0 }
 0x143   :  { %v2302_v9 = vpack.i.bf16 %v595_v6, %v603_v8  ;;  %v330_v11 = vadd.f32 %v3176_v48, %v329_v57  ;;  %v331_v12 = vpop.f32.mrb[23].mxu0 }
 0x144   :  { %v644_v12 = vmax.f32 %v530_v5, 0.0 }
 0x145   :  { %v604_v2 = vmax.f32 %v330_v11, 0.0  ;;  %2303 = vrot.lane.b32.xlu0 %v2302_v9, %s2490_s27  ;;  %v569_v11 = vpop.f32.mrb[18].mxu1 }
 0x146   :  { %v334_v15 = vpop.f32.mrb[24].mxu0 }
 0x147   :  { %v2312_v16 = vpack.i.bf16 %v596_v13, %v604_v2  ;;  %v3216_v17 = vadd.f32 %v3176_v48, %v334_v15  ;;  %v336_v19 = vpop.f32.mrb[25].mxu0  ;;  %v570_v13 = vadd.f32 %v3176_v48, %v569_v11  ;;  %v571_v2 = vpop.f32.mrb[19].mxu1 }
 0x148   :  { %v540_v19 = vadd.f32 %v3176_v48, %v539_v36  ;;  %v3255_v23 = vpop.f32.mrb[20].mxu1 }
 0x149   :  { %v605_v10 = vmax.f32 %v3216_v17, 0.0  ;;  %2308 = vrot.lane.b32.xlu1 %v2312_v16, %s2491_s28  ;;  %v652_v21 = vmax.f32 %v570_v13, 0.0 }
 0x14a   :  { %v339_v25 = vpop.f32.mrb[26].mxu0 }
 0x14b   :  { %v2317_v28 = vpack.i.bf16 %v597_v22, %v605_v10  ;;  %v340_v29 = vadd.f32 %v3176_v48, %v339_v25  ;;  %v341_v30 = vpop.f32.mrb[27].mxu0  ;;  %v576_v25 = vpop.f32.mrb[21].mxu1  ;;  %v3257_v27 = vpack.i.bf16 %v644_v12, %v652_v21 }
 0x14c   :  { %v579_v24 = vpop.f32.mrb[22].mxu1  ;;  %v646_v30 = vmax.f32 %v540_v19, 0.0 }
 0x14d   :  { %v606_v35 = vmax.f32 %v340_v29, 0.0  ;;  %2313 = vrot.lane.b32.xlu1 %v2312_v16, %s2489_s26  ;;  %2318 = vrot.lane.b32.xlu0 %v2317_v28, %s2490_s27  ;;  %v581_v33 = vpop.f32.mrb[23].mxu1 }
 0x14e   :  { %v344_v37 = vpop.f32.mrb[28].mxu0  ;;  %v584_v36 = vpop.f32.mrb[24].mxu1 }
 0x14f   :  { %v2327_v39 = vpack.i.bf16 %v598_v18, %v606_v35  ;;  %v345_v40 = vadd.f32 %v3176_v48, %v344_v37  ;;  %v346_v41 = vpop.f32.mrb[29].mxu0  ;;  %v580_v18 = vadd.f32 %v3176_v48, %v579_v24  ;;  %v585_v44 = vadd.f32 %v3176_v48, %v584_v36 }
 0x151   :  { %v607_v47 = vmax.f32 %v345_v40, 0.0  ;;  %2323 = vrot.lane.b32.xlu1 %v2327_v39, %s2491_s28  ;;  %2328 = vrot.lane.b32.xlu0 %v2327_v39, %s2489_s26  ;;  %v654_v35 = vmax.f32 %v580_v18, 0.0  ;;  %v647_v40 = vmax.f32 %v545_v32, 0.0  ;;  %v655_v46 = vmax.f32 %v585_v44, 0.0 }
 0x152   :  { %v349_v49 = vpop.f32.mrb[30].mxu0 }
 0x153   :  { %v2332_v52 = vpack.i.bf16 %v599_v45, %v607_v47  ;;  %v350_v54 = vadd.f32 %v3176_v48, %v349_v49  ;;  %v351_v55 = vpop.f32.mrb[31].mxu0  ;;  %v3262_v41 = vpack.i.bf16 %v646_v30, %v654_v35  ;;  %v586_v45 = vpop.f32.mrb[25].mxu1 }
 0x154   :  { %v589_v49 = vpop.f32.mrb[26].mxu1 }
 0x155   :  { %v608_v53 = vmax.f32 %v350_v54, 0.0  ;;  %2333 = vrot.lane.b32.xlu1 %v2332_v52, %s2490_s27  ;;  %v3265_v52 = vpack.i.bf16 %v647_v40, %v655_v46  ;;  %v590_v54 = vadd.f32 %v3176_v48, %v589_v49  ;;  %v591_v55 = vpop.f32.mrb[27].mxu1 }
 0x156   :  { %v3245_v34 = vpop.f32.mrb[32].mxu0 }
 0x157   :  { %v2337_v61 = vpack.i.bf16 %v600_v58, %v608_v53  ;;  %v356_v63 = vpop.f32.mrb[33].mxu0  ;;  %v656_v58 = vmax.f32 %v590_v54, 0.0 }
 0x159   :  { %2338 = vrot.lane.b32.xlu0 %v2337_v61, %s2491_s28  ;;  %v3268_v59 = vpack.i.bf16 %v648_v43, %v656_v58 }
 0x15a   :  { %v359_v57 = vpop.f32.mrb[34].mxu0 }
 0x15b   :  { %v361_v9 = vpop.f32.mrb[35].mxu0  ;;  %v360_v7 = vadd.f32 %v3176_v48, %v359_v57 }
 0x15d   :  { %v610_v13 = vmax.f32 %v360_v7, 0.0 }
 0x15e   :  { %v364_v15 = vpop.f32.mrb[36].mxu0 }
 0x15f   :  { %v366_v16 = vpop.f32.mrb[37].mxu0  ;;  %v3275_v2 = vadd.f32 %v3176_v48, %v364_v15 }
 0x162   :  { %v369_v28 = vpop.f32.mrb[38].mxu0 }
 0x163   :  { %v371_v29 = vpop.f32.mrb[39].mxu0  ;;  %v370_v30 = vadd.f32 %v3176_v48, %v369_v28 }
 0x164   :  { %v611_v29 = vmax.f32 %v3275_v2, 0.0 }
 0x165   :  { %v612_v35 = vmax.f32 %v370_v30, 0.0 }
 0x166   :  { %v374_v37 = vpop.f32.mrb[40].mxu0 }
 0x167   :  { %v376_v39 = vpop.f32.mrb[41].mxu0  ;;  %v3290_v38 = vadd.f32 %v3176_v48, %v374_v37 }
 0x169   :  { %v613_v45 = vmax.f32 %v3290_v38, 0.0 }
 0x16a   :  { %v379_v47 = vpop.f32.mrb[42].mxu0 }
 0x16b   :  { %v381_v50 = vpop.f32.mrb[43].mxu0  ;;  %v380_v46 = vadd.f32 %v3176_v48, %v379_v47 }
 0x16d   :  { %v614_v55 = vmax.f32 %v380_v46, 0.0 }
 0x16e   :  { %v384_v26 = vpop.f32.mrb[44].mxu0 }
 0x16f   :  { %v386_v53 = vpop.f32.mrb[45].mxu0  ;;  %v385_v58 = vadd.f32 %v3176_v48, %v384_v26 }
 0x172   :  { %v389_v61 = vpop.f32.mrb[46].mxu0 }
 0x173   :  { %v391_v63 = vpop.f32.mrb[47].mxu0 }
 0x176   :  { %v3270_v1 = vpop.f32.mrb[48].mxu0 }
 0x177   :  { %v396_v5 = vpop.f32.mrb[49].mxu0 }
 0x17a   :  { %v399_v9 = vpop.f32.mrb[50].mxu0 }
 0x17b   :  { %v400_v11 = vadd.f32 %v3176_v48, %v399_v9  ;;  %v401_v12 = vpop.f32.mrb[51].mxu0  ;;  %v1052_v9 = vld [vmem:[%s3974_s4 + $0x180] sm:$0xff] }
 0x17c   :  { %v615_v12 = vmax.f32 %v385_v58, 0.0 }
 0x17d   :  { %v618_v16 = vmax.f32 %v400_v11, 0.0  ;;  %v1053_v11 = vld [vmem:[%s3974_s4 + $0x188] sm:$0xff] }
 0x17e   :  { %v404_v19 = vpop.f32.mrb[52].mxu0 }
 0x17f   :  { %v2342_v21 = vpack.i.bf16 %v610_v13, %v618_v16  ;;  %v3278_v25 = vadd.f32 %v3176_v48, %v404_v19  ;;  %v406_v24 = vpop.f32.mrb[53].mxu0  ;;  %v390_v13 = vadd.f32 %v3176_v48, %v389_v61  ;;  %v2139_v16 = vpack.c.bf16 %v1053_v11, %v1052_v9 }
 0x181   :  { %v619_v57 = vmax.f32 %v3278_v25, 0.0  ;;  %2343 = vrot.lane.b32.xlu1 %v2342_v21, %s2489_s26  ;;  %2140 = vmatprep.subr.bf16.mxu1 %v2139_v16  ;;  %v1036_v16 = vld [vmem:[%s3974_s4 + $0x100] sm:$0xff] }
 0x182   :  { %v409_v32 = vpop.f32.mrb[54].mxu0 }
 0x183   :  { %v2347_v15 = vpack.i.bf16 %v611_v29, %v619_v57  ;;  %v410_v18 = vadd.f32 %v3176_v48, %v409_v32  ;;  %v411_v33 = vpop.f32.mrb[55].mxu0  ;;  %v616_v32 = vmax.f32 %v390_v13, 0.0 }
 0x185   :  { %v620_v36 = vmax.f32 %v410_v18, 0.0  ;;  %2348 = vrot.lane.b32.xlu0 %v2347_v15, %s2490_s27 }
 0x186   :  { %v414_v28 = vpop.f32.mrb[56].mxu0 }
 0x187   :  { %v2357_v39 = vpack.i.bf16 %v612_v35, %v620_v36  ;;  %v3294_v40 = vadd.f32 %v3176_v48, %v414_v28  ;;  %v416_v44 = vpop.f32.mrb[57].mxu0 }
 0x189   :  { %v621_v49 = vmax.f32 %v3294_v40, 0.0  ;;  %2353 = vrot.lane.b32.xlu1 %v2357_v39, %s2491_s28  ;;  %2358 = vrot.lane.b32.xlu0 %v2357_v39, %s2489_s26 }
 0x18a   :  { %v419_v37 = vpop.f32.mrb[58].mxu0 }
 0x18b   :  { %v2362_v50 = vpack.i.bf16 %v613_v45, %v621_v49  ;;  %v420_v43 = vadd.f32 %v3176_v48, %v419_v37  ;;  %v421_v54 = vpop.f32.mrb[59].mxu0 }
 0x18d   :  { %v622_v53 = vmax.f32 %v420_v43, 0.0  ;;  %2363 = vrot.lane.b32.xlu1 %v2362_v50, %s2490_s27 }
 0x18e   :  { %v424_v47 = vpop.f32.mrb[60].mxu0 }
 0x18f   :  { %v2372_v63 = vpack.i.bf16 %v614_v55, %v622_v53  ;;  %v425_v5 = vadd.f32 %v3176_v48, %v424_v47  ;;  %v426_v7 = vpop.f32.mrb[61].mxu0 }
 0x190   :  { %v315_v7 = vadd.f32 %v3176_v48, %v3165_v42 }
 0x191   :  { %v623_v26 = vmax.f32 %v425_v5, 0.0  ;;  %2373 = vrot.lane.b32.xlu1 %v2372_v63, %s2489_s26  ;;  %2368 = vrot.lane.b32.xlu0 %v2372_v63, %s2491_s28  ;;  %v275_v5 = vadd.f32 %v3176_v48, %v3071_v51 }
 0x192   :  { %v429_v19 = vpop.f32.mrb[62].mxu0 }
 0x193   :  { %v2377_v21 = vpack.i.bf16 %v615_v12, %v623_v26  ;;  %v430_v24 = vadd.f32 %v3176_v48, %v429_v19  ;;  %v431_v30 = vpop.f32.mrb[63].mxu0  ;;  %v1037_v19 = vld [vmem:[%s3974_s4 + $0x108] sm:$0xff]  ;;  %v593_v42 = vmax.f32 %v275_v5, 0.0 }
 0x194   :  { %v601_v30 = vmax.f32 %v315_v7, 0.0 }
 0x195   :  { %v624_v15 = vmax.f32 %v430_v24, 0.0  ;;  %2378 = vrot.lane.b32.xlu0 %v2377_v21, %s2490_s27 }
 0x196   :  { %v3320_v18 = vpop.f32.mrb[64].mxu0 }
 0x197   :  { %v2382_v33 = vpack.i.bf16 %v616_v32, %v624_v15  ;;  %v436_v61 = vpop.f32.mrb[65].mxu0  ;;  %v435_v38 = vadd.f32 %v3176_v48, %v3320_v18 }
 0x199   :  { %2383 = vrot.lane.b32.xlu1 %v2382_v33, %s2491_s28 }
 0x19a   :  { %v439_v35 = vpop.f32.mrb[66].mxu0 }
 0x19b   :  { %v441_v36 = vpop.f32.mrb[67].mxu0  ;;  %v440_v21 = vadd.f32 %v3176_v48, %v439_v35  ;;  %v1054_v35 = vld [vmem:[%s3974_s4 + $0x190] sm:$0xff] }
 0x19e   :  { %v444_v28 = vpop.f32.mrb[68].mxu0 }
 0x19f   :  { %v446_v39 = vpop.f32.mrb[69].mxu0  ;;  %v3345_v15 = vadd.f32 %v3176_v48, %v444_v28 }
 0x1a0   :  { %v2141_v39 = vpack.c.bf16 %v1037_v19, %v1036_v16 }
 0x1a2   :  { %v449_v44 = vpop.f32.mrb[70].mxu0 }
 0x1a3   :  { %v451_v46 = vpop.f32.mrb[71].mxu0 }
 0x1a4   :  { %v1055_v46 = vld [vmem:[%s3974_s4 + $0x198] sm:$0xff] }
 0x1a5   :  { %v2143_v19 = vpack.c.bf16 %v1055_v46, %v1054_v35 }
 0x1a6   :  { %v3323_v37 = vpop.f32.mrb[72].mxu0 }
 0x1a7   :  { %v456_v50 = vpop.f32.mrb[73].mxu0 }
 0x1aa   :  { %v3325_v43 = vpop.f32.mrb[74].mxu0 }
 0x1ab   :  { %v461_v54 = vpop.f32.mrb[75].mxu0 }
 0x1ae   :  { %v3327_v55 = vpop.f32.mrb[76].mxu0 }
 0x1af   :  { %v466_v58 = vpop.f32.mrb[77].mxu0 }
 0x1b2   :  { %v3329_v53 = vpop.f32.mrb[78].mxu0 }
 0x1b3   :  { %v471_v47 = vpop.f32.mrb[79].mxu0  ;;  %v2299_v63 = vpop.permute.xlu0 %2298 }
 0x1b4   :  { %v2301_v13 = vunpack.i.h.bf16 %v2299_v63  ;;  %v2300_v26 = vunpack.i.l.bf16 %v2299_v63  ;;  %v626_v47 = vmax.f32 %v440_v21, 0.0 }
 0x1b6   :  { %v3335_v9 = vpop.f32.mrb[80].mxu0  ;;  %v706_v50 = vsel %vm705_vm0, %v593_v42, %v2301_v13  ;;  %v711_v28 = vsel %vm705_vm0, %v601_v30, %v2300_v26  ;;  %v1038_v13 = vld [vmem:[%s3974_s4 + $0x110] sm:$0xff]  ;;  %v1039_v26 = vld [vmem:[%s3974_s4 + $0x118] sm:$0xff]  ;;  %v1056_v30 = vld [vmem:[%s3974_s4 + $0x1a0] sm:$0xff] }
 0x1b7   :  { %v476_v11 = vpop.f32.mrb[81].mxu0  ;;  %v2304_v12 = vpop.permute.xlu0 %2303 }
 0x1b8   :  { %v2306_v51 = vunpack.i.h.bf16 %v2304_v12  ;;  %v2305_v24 = vunpack.i.l.bf16 %v2304_v12 }
 0x1ba   :  { %v479_v32 = vpop.f32.mrb[82].mxu0  ;;  %v708_v63 = vsel %vm707_vm1, %v706_v50, %v2306_v51  ;;  %v712_v7 = vsel %vm707_vm1, %v711_v28, %v2305_v24  ;;  %v2145_v28 = vpack.c.bf16 %v1039_v26, %v1038_v13  ;;  %v1059_v13 = vld [vmem:[%s3974_s4 + $0x1b8] sm:$0xff]  ;;  %v3404_v26 = vadd.f32 %v3176_v48, %v3323_v37 }
 0x1bb   :  { %v480_v33 = vadd.f32 %v3176_v48, %v479_v32  ;;  %v481_v61 = vpop.f32.mrb[83].mxu0  ;;  %v2309_v36 = vpop.permute.xlu1 %2308  ;;  %v1057_v32 = vld [vmem:[%s3974_s4 + $0x1a8] sm:$0xff]  ;;  %v2149_v37 = vpack.c.bf16 %v1041_v62, %v1040_v3 }
 0x1bc   :  { %v2311_v54 = vunpack.i.h.bf16 %v2309_v36  ;;  %v2310_v58 = vunpack.i.l.bf16 %v2309_v36  ;;  %v450_v61 = vadd.f32 %v3176_v48, %v449_v44 }
 0x1bd   :  { %v634_v5 = vmax.f32 %v480_v33, 0.0  ;;  %v627_v33 = vmax.f32 %v3345_v15, 0.0 }
 0x1be   :  { %v484_v11 = vpop.f32.mrb[84].mxu0  ;;  %v713_v12 = vsel %vm709_vm2, %v712_v7, %v2310_v58  ;;  %v710_v16 = vsel %vm709_vm2, %v708_v63, %v2311_v54 }
 0x1bf   :  { %v2387_v21 = vpack.i.bf16 %v626_v47, %v634_v5  ;;  %v3367_v51 = vadd.f32 %v3176_v48, %v484_v11  ;;  %v486_v42 = vpop.f32.mrb[85].mxu0  ;;  %v2314_v24 = vpop.permute.xlu1 %2313  ;;  %1139 = vmatprep.mubr.f32.mxu1 %v713_v12  ;;  %v2147_v5 = vpack.c.bf16 %v1057_v32, %v1056_v30  ;;  %v460_v32 = vadd.f32 %v3176_v48, %v3325_v43  ;;  %v1043_v43 = vld [vmem:[%s3974_s4 + $0x138] sm:$0xff] }
 0x1c0   :  { %v2316_v36 = vunpack.i.h.bf16 %v2314_v24  ;;  %v2315_v35 = vunpack.i.l.bf16 %v2314_v24  ;;  %v2319_v46 = vpop.permute.xlu0 %2318  ;;  %1140 = vmatmul.mubr.f32.vlgmr.msra.gmra.mrb[28].mxu1 %v710_v16 }
 0x1c1   :  { %v635_v50 = vmax.f32 %v3367_v51, 0.0  ;;  %v2321_v54 = vunpack.i.h.bf16 %v2319_v46  ;;  %v2320_v58 = vunpack.i.l.bf16 %v2319_v46  ;;  %2388 = vrot.lane.b32.xlu0 %v2387_v21, %s2489_s26  ;;  %2142 = vmatpush3.bf16.msra.mxu1 %v2141_v39 }
 0x1c2   :  { %v489_v47 = vpop.f32.mrb[86].mxu0  ;;  %v767_v63 = vsel %vm705_vm0, %v603_v8, %v2315_v35  ;;  %v764_v44 = vsel %vm705_vm0, %v595_v6, %v2316_v36  ;;  %2144 = vmatprep.subr.bf16.mxu1 %v2143_v19  ;;  %v628_v6 = vmax.f32 %v450_v61, 0.0  ;;  %v1058_v19 = vld [vmem:[%s3974_s4 + $0x1b0] sm:$0xff] }
 0x1c3   :  { %v2392_v7 = vpack.i.bf16 %v627_v33, %v635_v50  ;;  %v490_v11 = vadd.f32 %v3176_v48, %v489_v47  ;;  %v491_v39 = vpop.f32.mrb[87].mxu0  ;;  %v2324_v12 = vpop.permute.xlu1 %2323  ;;  %v768_v24 = vsel %vm707_vm1, %v767_v63, %v2320_v58  ;;  %v765_v30 = vsel %vm707_vm1, %v764_v44, %v2321_v54  ;;  %v1042_v54 = vld [vmem:[%s3974_s4 + $0x130] sm:$0xff]  ;;  %v1060_v44 = vld [vmem:[%s3974_s4 + $0x1c0] sm:$0xff] }
 0x1c4   :  { %v2326_v8 = vunpack.i.h.bf16 %v2324_v12  ;;  %v2325_v16 = vunpack.i.l.bf16 %v2324_v12  ;;  %v2329_v42 = vpop.permute.xlu0 %2328  ;;  %v2151_v58 = vpack.c.bf16 %v1059_v13, %v1058_v19  ;;  %v629_v39 = vmax.f32 %v3404_v26, 0.0 }
 0x1c5   :  { %v636_v21 = vmax.f32 %v490_v11, 0.0  ;;  %2393 = vrot.lane.b32.xlu1 %v2392_v7, %s2490_s27  ;;  %2146 = vmatpush3.bf16.msra.mxu1 %v2145_v28  ;;  %v2331_v28 = vunpack.i.h.bf16 %v2329_v42  ;;  %v2330_v63 = vunpack.i.l.bf16 %v2329_v42  ;;  %v630_v19 = vmax.f32 %v460_v32, 0.0  ;;  %v1063_v32 = vld [vmem:[%s3974_s4 + $0x1d8] sm:$0xff] }
 0x1c6   :  { %v494_v61 = vpop.f32.mrb[88].mxu0  ;;  %v769_v36 = vsel %vm709_vm2, %v768_v24, %v2325_v16  ;;  %v766_v35 = vsel %vm709_vm2, %v765_v30, %v2326_v8  ;;  %2148 = vmatprep.subr.bf16.mxu1 %v2147_v5  ;;  %v1061_v5 = vld [vmem:[%s3974_s4 + $0x1c8] sm:$0xff]  ;;  %v2153_v8 = vpack.c.bf16 %v1043_v43, %v1042_v54  ;;  %v1044_v16 = vld [vmem:[%s3974_s4 + $0x140] sm:$0xff] }
 0x1c7   :  { %v2402_v46 = vpack.i.bf16 %v628_v6, %v636_v21  ;;  %v3414_v47 = vadd.f32 %v3176_v48, %v494_v61  ;;  %v496_v7 = vpop.f32.mrb[89].mxu0  ;;  %v2334_v11 = vpop.permute.xlu1 %2333  ;;  %1144 = vmatprep.mubr.f32.mxu1 %v769_v36  ;;  %v2155_v30 = vpack.c.bf16 %v1061_v5, %v1060_v44  ;;  %v1045_v61 = vld [vmem:[%s3974_s4 + $0x148] sm:$0xff]  ;;  %v1062_v36 = vld [vmem:[%s3974_s4 + $0x1d0] sm:$0xff] }
 0x1c8   :  { %1145 = vmatmul.mubr.f32.gmra.mrb[30].mxu1 %v766_v35  ;;  %v2336_v3 = vunpack.i.h.bf16 %v2334_v11  ;;  %v2335_v62 = vunpack.i.l.bf16 %v2334_v11  ;;  %v820_v7 = vsel %vm705_vm0, %v597_v22, %v2331_v28  ;;  %v465_v11 = vadd.f32 %v3176_v48, %v3327_v55  ;;  %v1046_v55 = vld [vmem:[%s3974_s4 + $0x150] sm:$0xff] }
 0x1c9   :  { %v637_v12 = vmax.f32 %v3414_v47, 0.0  ;;  %2403 = vrot.lane.b32.xlu1 %v2402_v46, %s2489_s26  ;;  %2398 = vrot.lane.b32.xlu0 %v2402_v46, %s2491_s28  ;;  %v823_v46 = vsel %vm705_vm0, %v605_v10, %v2330_v63  ;;  %v2157_v10 = vpack.c.bf16 %v1045_v61, %v1044_v16  ;;  %v2159_v14 = vpack.c.bf16 %v1063_v32, %v1062_v36  ;;  %v1049_v32 = vld [vmem:[%s3974_s4 + $0x168] sm:$0xff] }
 0x1ca   :  { %v499_v6 = vpop.f32.mrb[90].mxu0  ;;  %2150 = vmatpush3.bf16.msra.mxu1 %v2149_v37  ;;  %v824_v54 = vsel %vm707_vm1, %v823_v46, %v2335_v62  ;;  %v821_v43 = vsel %vm707_vm1, %v820_v7, %v2336_v3  ;;  %v1047_v3 = vld [vmem:[%s3974_s4 + $0x158] sm:$0xff]  ;;  %v3471_v62 = vadd.f32 %v3176_v48, %v3218_v20  ;;  %v631_v16 = vmax.f32 %v465_v11, 0.0 }
 0x1cb   :  { %v2407_v13 = vpack.i.bf16 %v629_v39, %v637_v12  ;;  %v500_v21 = vadd.f32 %v3176_v48, %v499_v6  ;;  %v501_v42 = vpop.f32.mrb[91].mxu0  ;;  %v2339_v24 = vpop.permute.xlu0 %2338  ;;  %2152 = vmatprep.subr.bf16.mxu1 %v2151_v58  ;;  %v1064_v6 = vld [vmem:[%s3974_s4 + $0x1e0] sm:$0xff]  ;;  %v3485_v20 = vadd.f32 %v3176_v48, %v3249_v4  ;;  %v1066_v4 = vld [vmem:[%s3974_s4 + $0x1f0] sm:$0xff] }
 0x1cc   :  { %v2341_v35 = vunpack.i.h.bf16 %v2339_v24  ;;  %v2340_v37 = vunpack.i.l.bf16 %v2339_v24  ;;  %v2161_v42 = vpack.c.bf16 %v1047_v3, %v1046_v55  ;;  %v643_v46 = vmax.f32 %v3471_v62, 0.0 }
 0x1cd   :  { %v638_v58 = vmax.f32 %v500_v21, 0.0  ;;  %2408 = vrot.lane.b32.xlu0 %v2407_v13, %s2490_s27  ;;  %v651_v11 = vmax.f32 %v3485_v20, 0.0 }
 0x1ce   :  { %v504_v44 = vpop.f32.mrb[92].mxu0  ;;  %v825_v5 = vsel %vm709_vm2, %v824_v54, %v2340_v37  ;;  %v822_v17 = vsel %vm709_vm2, %v821_v43, %v2341_v35  ;;  %2154 = vmatpush3.bf16.msra.mxu1 %v2153_v8  ;;  %v1065_v8 = vld [vmem:[%s3974_s4 + $0x1e8] sm:$0xff]  ;;  %v1067_v35 = vld [vmem:[%s3974_s4 + $0x1f8] sm:$0xff] }
 0x1cf   :  { %v2417_v63 = vpack.i.bf16 %v630_v19, %v638_v58  ;;  %v505_v22 = vadd.f32 %v3176_v48, %v504_v44  ;;  %v506_v28 = vpop.f32.mrb[93].mxu0  ;;  %1149 = vmatprep.mubr.f32.mxu1 %v825_v5  ;;  %2156 = vmatprep.subr.bf16.mxu1 %v2155_v30  ;;  %v470_v19 = vadd.f32 %v3176_v48, %v3329_v53  ;;  %v1048_v53 = vld [vmem:[%s3974_s4 + $0x160] sm:$0xff] }
 0x1d0   :  { %1150 = vmatmul.mubr.f32.gmra.mrb[32].mxu1 %v822_v17  ;;  %v2163_v36 = vpack.c.bf16 %v1065_v8, %v1064_v6  ;;  %v2165_v54 = vpack.c.bf16 %v1049_v32, %v1048_v53  ;;  %v560_v44 = vadd.f32 %v3176_v48, %v3247_v60  ;;  %v2167_v17 = vpack.c.bf16 %v1067_v35, %v1066_v4 }
 0x1d1   :  { %v639_v13 = vmax.f32 %v505_v22, 0.0  ;;  %2413 = vrot.lane.b32.xlu1 %v2417_v63, %s2491_s28  ;;  %2418 = vrot.lane.b32.xlu0 %v2417_v63, %s2489_s26  ;;  %v632_v37 = vmax.f32 %v470_v19, 0.0  ;;  %v2432_v63 = vpack.i.bf16 %v643_v46, %v651_v11  ;;  %v3522_v8 = vadd.f32 %v3176_v48, %v3230_v31 }
 0x1d2   :  { %v509_v21 = vpop.f32.mrb[94].mxu0  ;;  %2158 = vmatpush3.bf16.msra.mxu1 %v2157_v10  ;;  %v1050_v10 = vld [vmem:[%s3974_s4 + $0x170] sm:$0xff]  ;;  %v650_v28 = vmax.f32 %v560_v44, 0.0  ;;  %v3526_v19 = vadd.f32 %v3176_v48, %v3255_v23 }
 0x1d3   :  { %v2422_v24 = vpack.i.bf16 %v631_v16, %v639_v13  ;;  %v510_v30 = vadd.f32 %v3176_v48, %v509_v21  ;;  %v511_v61 = vpop.f32.mrb[95].mxu0  ;;  %2160 = vmatprep.subr.bf16.mxu1 %v2159_v14  ;;  %v1051_v14 = vld [vmem:[%s3974_s4 + $0x178] sm:$0xff]  ;;  %v645_v13 = vmax.f32 %v3522_v8, 0.0 }
 0x1d4   :  { %v2169_v60 = vpack.c.bf16 %v1051_v14, %v1050_v10  ;;  %v653_v21 = vmax.f32 %v3526_v19, 0.0 }
 0x1d5   :  { %v640_v7 = vmax.f32 %v510_v30, 0.0  ;;  %2423 = vrot.lane.b32.xlu1 %v2422_v24, %s2490_s27 }
 0x1d6   :  { %v3503_v58 = vpop.f32.mrb[96].mxu0  ;;  %2162 = vmatpush3.bf16.msra.mxu1 %v2161_v42  ;;  %v2452_v31 = vpack.i.bf16 %v645_v13, %v653_v21  ;;  %v395_v42 = vadd.f32 %v3176_v48, %v3270_v1 }
 0x1d7   :  { %v2427_v43 = vpack.i.bf16 %v632_v37, %v640_v7  ;;  %v516_v5 = vpop.f32.mrb[97].mxu0  ;;  %2164 = vmatprep.subr.bf16.mxu1 %v2163_v36 }
 0x1d9   :  { %2428 = vrot.lane.b32.xlu0 %v2427_v43, %s2491_s28 }
 0x1da   :  { %v519_v22 = vpop.f32.mrb[98].mxu0  ;;  %2166 = vmatpush3.bf16.msra.mxu1 %v2165_v54 }
 0x1db   :  { %v520_v55 = vadd.f32 %v3176_v48, %v519_v22  ;;  %v521_v3 = vpop.f32.mrb[99].mxu0  ;;  %2168 = vmatprep.subr.bf16.mxu1 %v2167_v17 }
 0x1dd   :  { %v642_v6 = vmax.f32 %v520_v55, 0.0  ;;  %2433 = vrot.lane.b32.xlu0 %v2432_v63, %s2490_s27 }
 0x1de   :  { %2170 = vmatpush3.bf16.msra.mxu1 %v2169_v60 }
 0x1df   :  { %v2437_v16 = vpack.i.bf16 %v642_v6, %v650_v28 }
 0x1e1   :  { %2438 = vrot.lane.b32.xlu1 %v2437_v16, %s2489_s26  ;;  %2448 = vrot.lane.b32.xlu0 %v3257_v27, %s2489_s26 }
 0x1e5   :  { %2443 = vrot.lane.b32.xlu1 %v3257_v27, %s2491_s28  ;;  %2458 = vrot.lane.b32.xlu0 %v3262_v41, %s2491_s28  ;;  %v355_v27 = vadd.f32 %v3176_v48, %v3245_v34 }
 0x1e7   :  { %v609_v32 = vmax.f32 %v355_v27, 0.0 }
 0x1e9   :  { %2453 = vrot.lane.b32.xlu1 %v2452_v31, %s2490_s27  ;;  %2468 = vrot.lane.b32.xlu0 %v3265_v52, %s2490_s27  ;;  %v617_v52 = vmax.f32 %v395_v42, 0.0 }
 0x1ed   :  { %2463 = vrot.lane.b32.xlu1 %v3262_v41, %s2489_s26 }
 0x1f1   :  { %2473 = vrot.lane.b32.xlu1 %v3268_v59, %s2491_s28 }
 0x1f3   :  { %v2344_v23 = vpop.permute.xlu1 %2343 }
 0x1f4   :  { %v2346_v30 = vunpack.i.h.bf16 %v2344_v23  ;;  %v2345_v61 = vunpack.i.l.bf16 %v2344_v23 }
 0x1f6   :  { %v717_v37 = vsel %vm705_vm0, %v617_v52, %v2345_v61  ;;  %v714_v59 = vsel %vm705_vm0, %v609_v32, %v2346_v30 }
 0x1f7   :  { %v2349_v24 = vpop.permute.xlu0 %2348 }
 0x1f8   :  { %v2351_v36 = vunpack.i.h.bf16 %v2349_v24  ;;  %v2350_v53 = vunpack.i.l.bf16 %v2349_v24 }
 0x1fa   :  { %v718_v34 = vsel %vm707_vm1, %v717_v37, %v2350_v53  ;;  %v715_v54 = vsel %vm707_vm1, %v714_v59, %v2351_v36 }
 0x1fb   :  { %v2354_v4 = vpop.permute.xlu1 %2353  ;;  %v2359_v7 = vpop.permute.xlu0 %2358 }
 0x1fc   :  { %v2356_v35 = vunpack.i.h.bf16 %v2354_v4  ;;  %v2355_v41 = vunpack.i.l.bf16 %v2354_v4  ;;  %v2361_v5 = vunpack.i.h.bf16 %v2359_v7  ;;  %v2360_v17 = vunpack.i.l.bf16 %v2359_v7 }
 0x1fd   :  { %v625_v7 = vmax.f32 %v435_v38, 0.0 }
 0x1fe   :  { %v3557_v1 = vsel %vm709_vm2, %v718_v34, %v2355_v41  ;;  %v3560_v43 = vsel %vm709_vm2, %v715_v54, %v2356_v35  ;;  %v773_v28 = vsel %vm705_vm0, %v619_v57, %v2360_v17  ;;  %v770_v55 = vsel %vm705_vm0, %v611_v29, %v2361_v5 }
 0x1ff   :  { %v2364_v44 = vpop.permute.xlu1 %2363  ;;  %1154 = vmatprep.mubr.f32.mxu1 %v3557_v1 }
 0x200   :  { %1155 = vmatmul.mubr.f32.gmra.mrb[34].mxu1 %v3560_v43  ;;  %v2366_v10 = vunpack.i.h.bf16 %v2364_v44  ;;  %v2365_v14 = vunpack.i.l.bf16 %v2364_v44 }
 0x202   :  { %v774_v6 = vsel %vm707_vm1, %v773_v28, %v2365_v14  ;;  %v771_v16 = vsel %vm707_vm1, %v770_v55, %v2366_v10 }
 0x203   :  { %v2369_v63 = vpop.permute.xlu0 %2368  ;;  %v2374_v3 = vpop.permute.xlu1 %2373 }
 0x204   :  { %v2371_v22 = vunpack.i.h.bf16 %v2369_v63  ;;  %v2370_v60 = vunpack.i.l.bf16 %v2369_v63  ;;  %v2376_v25 = vunpack.i.h.bf16 %v2374_v3  ;;  %v2375_v57 = vunpack.i.l.bf16 %v2374_v3 }
 0x206   :  { %v3573_v31 = vsel %vm709_vm2, %v774_v6, %v2370_v60  ;;  %v3576_v23 = vsel %vm709_vm2, %v771_v16, %v2371_v22  ;;  %v829_v61 = vsel %vm705_vm0, %v621_v49, %v2375_v57  ;;  %v826_v36 = vsel %vm705_vm0, %v613_v45, %v2376_v25 }
 0x207   :  { %v2379_v27 = vpop.permute.xlu0 %2378  ;;  %1159 = vmatprep.mubr.f32.mxu1 %v3573_v31  ;;  %v475_v45 = vadd.f32 %v3176_v48, %v3335_v9 }
 0x208   :  { %1160 = vmatmul.mubr.f32.gmra.mrb[36].mxu1 %v3576_v23  ;;  %v2381_v2 = vunpack.i.h.bf16 %v2379_v27  ;;  %v2380_v29 = vunpack.i.l.bf16 %v2379_v27 }
 0x209   :  { %v633_v34 = vmax.f32 %v475_v45, 0.0 }
 0x20a   :  { %v830_v53 = vsel %vm707_vm1, %v829_v61, %v2380_v29  ;;  %v827_v32 = vsel %vm707_vm1, %v826_v36, %v2381_v2 }
 0x20b   :  { %v2384_v42 = vpop.permute.xlu1 %2383 }
 0x20c   :  { %v2386_v24 = vunpack.i.h.bf16 %v2384_v42  ;;  %v2385_v30 = vunpack.i.l.bf16 %v2384_v42 }
 0x20e   :  { %v3589_v52 = vsel %vm709_vm2, %v830_v53, %v2385_v30  ;;  %v3592_v4 = vsel %vm709_vm2, %v827_v32, %v2386_v24 }
 0x20f   :  { %1164 = vmatprep.mubr.f32.mxu1 %v3589_v52 }
 0x210   :  { %1165 = vmatmul.mubr.f32.gmra.mrb[38].mxu1 %v3592_v4 }
 0x233   :  { %v2389_v40 = vpop.permute.xlu0 %2388 }
 0x234   :  { %v2391_v35 = vunpack.i.h.bf16 %v2389_v40  ;;  %v2390_v41 = vunpack.i.l.bf16 %v2389_v40 }
 0x236   :  { %v859_v17 = vsel %vm705_vm0, %v633_v34, %v2390_v41  ;;  %v856_v10 = vsel %vm705_vm0, %v625_v7, %v2391_v35 }
 0x237   :  { %v2394_v49 = vpop.permute.xlu1 %2393 }
 0x238   :  { %v2396_v37 = vunpack.i.h.bf16 %v2394_v49  ;;  %v2395_v59 = vunpack.i.l.bf16 %v2394_v49 }
 0x23a   :  { %v860_v18 = vsel %vm707_vm1, %v859_v17, %v2395_v59  ;;  %v857_v63 = vsel %vm707_vm1, %v856_v10, %v2396_v37 }
 0x23b   :  { %v2399_v54 = vpop.permute.xlu0 %2398  ;;  %v2404_v14 = vpop.permute.xlu1 %2403 }
 0x23c   :  { %v2401_v44 = vunpack.i.h.bf16 %v2399_v54  ;;  %v2400_v5 = vunpack.i.l.bf16 %v2399_v54  ;;  %v2406_v60 = vunpack.i.h.bf16 %v2404_v14  ;;  %v2405_v28 = vunpack.i.l.bf16 %v2404_v14 }
 0x23e   :  { %v861_v48 = vsel %vm709_vm2, %v860_v18, %v2400_v5  ;;  %v858_v9 = vsel %vm709_vm2, %v857_v63, %v2401_v44  ;;  %v887_v25 = vsel %vm705_vm0, %v635_v50, %v2405_v28  ;;  %v884_v57 = vsel %vm705_vm0, %v627_v33, %v2406_v60 }
 0x23f   :  { %v2409_v22 = vpop.permute.xlu0 %2408  ;;  %1169 = vmatprep.mubr.f32.mxu1 %v861_v48 }
 0x240   :  { %1170 = vmatmul.mubr.f32.gmra.mrb[40].mxu1 %v858_v9  ;;  %v2411_v55 = vunpack.i.h.bf16 %v2409_v22  ;;  %v2410_v3 = vunpack.i.l.bf16 %v2409_v22 }
 0x242   :  { %v888_v29 = vsel %vm707_vm1, %v887_v25, %v2410_v3  ;;  %v885_v42 = vsel %vm707_vm1, %v884_v57, %v2411_v55 }
 0x243   :  { %v2414_v6 = vpop.permute.xlu1 %2413  ;;  %v2419_v2 = vpop.permute.xlu0 %2418 }
 0x244   :  { %v2416_v16 = vunpack.i.h.bf16 %v2414_v6  ;;  %v2415_v27 = vunpack.i.l.bf16 %v2414_v6  ;;  %v2421_v36 = vunpack.i.h.bf16 %v2419_v2  ;;  %v2420_v53 = vunpack.i.l.bf16 %v2419_v2 }
 0x246   :  { %v889_v24 = vsel %vm709_vm2, %v888_v29, %v2415_v27  ;;  %v886_v30 = vsel %vm709_vm2, %v885_v42, %v2416_v16  ;;  %v915_v33 = vsel %vm705_vm0, %v637_v12, %v2420_v53  ;;  %v912_v38 = vsel %vm705_vm0, %v629_v39, %v2421_v36  ;;  %v2487_v12 = vld [vmem:[%s3975_s3] ss:$0 sm:$0xff] }
 0x247   :  { %v2424_v61 = vpop.permute.xlu1 %2423  ;;  %1174 = vmatprep.mubr.f32.mxu1 %v889_v24 }
 0x248   :  { %1175 = vmatmul.mubr.f32.gmra.mrb[42].mxu1 %v886_v30  ;;  %v2426_v51 = vunpack.i.h.bf16 %v2424_v61  ;;  %v2425_v50 = vunpack.i.l.bf16 %v2424_v61 }
 0x24a   :  { %v916_v45 = vsel %vm707_vm1, %v915_v33, %v2425_v50  ;;  %v913_v49 = vsel %vm707_vm1, %v912_v38, %v2426_v51 }
 0x24b   :  { %v2429_v32 = vpop.permute.xlu0 %2428 }
 0x24c   :  { %v2431_v15 = vunpack.i.h.bf16 %v2429_v32  ;;  %v2430_v40 = vunpack.i.l.bf16 %v2429_v32 }
 0x24e   :  { %v917_v35 = vsel %vm709_vm2, %v916_v45, %v2430_v40  ;;  %v914_v41 = vsel %vm709_vm2, %v913_v49, %v2431_v15  ;;  %v1340_v45 = vld [vmem:[%s3976_s6 + $0x80] sm:$0xff]  ;;  %v1341_v49 = vld [vmem:[%s3976_s6 + $0x88] sm:$0xff] }
 0x24f   :  { %1179 = vmatprep.mubr.f32.mxu1 %v917_v35  ;;  %v2434_v47 = vpop.permute.xlu0 %2433 }
 0x250   :  { %1180 = vmatmul.mubr.f32.gmra.mrb[44].mxu1 %v914_v41  ;;  %v2435_v17 = vunpack.i.l.bf16 %v2434_v47 }
 0x251   :  { %1249 = vmatprep.mubr.f32.mxu1 %v3557_v1  ;;  %v555_v1 = vadd.f32 %v2487_v12, %v3242_v56  ;;  %v2436_v56 = vunpack.i.h.bf16 %v2434_v47  ;;  %v1343_v47 = vld [vmem:[%s3976_s6 + $0x98] sm:$0xff] }
 0x253   :  { %v2439_v37 = vpop.permute.xlu1 %2438  ;;  %v2449_v59 = vpop.permute.xlu0 %2448  ;;  %v649_v7 = vmax.f32 %v555_v1, 0.0  ;;  %v1326_v1 = vld [vmem:[%s3976_s6 + $0x10] sm:$0xff] }
 0x254   :  { %1250 = vmatmul.mubr.f32.vlgmr.msra.gmra.mrb[46].mxu1 %v3560_v43  ;;  %v2440_v43 = vunpack.i.l.bf16 %v2439_v37  ;;  %v2441_v34 = vunpack.i.h.bf16 %v2439_v37  ;;  %v2451_v14 = vunpack.i.h.bf16 %v2449_v59  ;;  %v1325_v37 = vld [vmem:[%s3976_s6 + $0x8] sm:$0xff] }
 0x255   :  { %1254 = vmatprep.mubr.f32.mxu1 %v3573_v31  ;;  %v515_v31 = vadd.f32 %v2487_v12, %v3503_v58 }
 0x256   :  { %v945_v44 = vsel %vm705_vm0, %v649_v7, %v2440_v43  ;;  %v970_v27 = vsel %vm705_vm0, %v643_v46, %v2451_v14  ;;  %v1344_v43 = vld [vmem:[%s3976_s6 + $0xa0] sm:$0xff]  ;;  %v1330_v14 = vld [vmem:[%s3976_s6 + $0x30] sm:$0xff] }
 0x257   :  { %v2444_v26 = vpop.permute.xlu1 %2443  ;;  %v641_v5 = vmax.f32 %v515_v31, 0.0  ;;  %v946_v63 = vsel %vm707_vm1, %v945_v44, %v2435_v17  ;;  %v1345_v31 = vld [vmem:[%s3976_s6 + $0xa8] sm:$0xff]  ;;  %v1346_v44 = vld [vmem:[%s3976_s6 + $0xb0] sm:$0xff] }
 0x258   :  { %1255 = vmatmul.mubr.f32.gmra.mrb[48].mxu1 %v3576_v23  ;;  %v2459_v23 = vpop.permute.xlu0 %2458  ;;  %v2446_v18 = vunpack.i.h.bf16 %v2444_v26 }
 0x259   :  { %1259 = vmatprep.mubr.f32.mxu1 %v3589_v52  ;;  %v2450_v52 = vunpack.i.l.bf16 %v2449_v59  ;;  %v942_v58 = vsel %vm705_vm0, %v641_v5, %v2441_v34  ;;  %v2460_v22 = vunpack.i.l.bf16 %v2459_v23  ;;  %v2461_v20 = vunpack.i.h.bf16 %v2459_v23  ;;  %v1327_v59 = vld [vmem:[%s3976_s6 + $0x18] sm:$0xff] }
 0x25a   :  { %v943_v16 = vsel %vm707_vm1, %v942_v58, %v2436_v56  ;;  %v2177_v7 = vpack.c.bf16 %v1327_v59, %v1326_v1  ;;  %v2179_v34 = vpack.c.bf16 %v1345_v31, %v1344_v43  ;;  %v1347_v5 = vld [vmem:[%s3976_s6 + $0xb8] sm:$0xff]  ;;  %v1349_v58 = vld [vmem:[%s3976_s6 + $0xc8] sm:$0xff] }
 0x25b   :  { %v2454_v39 = vpop.permute.xlu1 %2453  ;;  %v944_v57 = vsel %vm709_vm2, %v943_v16, %v2446_v18  ;;  %v2183_v56 = vpack.c.bf16 %v1347_v5, %v1346_v44  ;;  %v1331_v18 = vld [vmem:[%s3976_s6 + $0x38] sm:$0xff]  ;;  %v1373_v5 = vld [vmem:[%s3976_s6 + $0x188] sm:$0xff] }
 0x25c   :  { %1260 = vmatmul.mubr.f32.gmra.mrb[50].mxu1 %v3592_v4  ;;  %v2445_v4 = vunpack.i.l.bf16 %v2444_v26  ;;  %v2455_v10 = vunpack.i.l.bf16 %v2454_v39  ;;  %v2469_v28 = vpop.permute.xlu0 %2468  ;;  %v1342_v26 = vld [vmem:[%s3976_s6 + $0x90] sm:$0xff] }
 0x25d   :  { %1264 = vmatprep.mubr.f32.mxu1 %v861_v48  ;;  %v973_v48 = vsel %vm705_vm0, %v651_v11, %v2450_v52  ;;  %v2470_v11 = vunpack.i.l.bf16 %v2469_v28  ;;  %v2175_v12 = vpack.c.bf16 %v1343_v47, %v1342_v26  ;;  %v1328_v52 = vld [vmem:[%s3976_s6 + $0x20] sm:$0xff] }
 0x25e   :  { %v947_v55 = vsel %vm709_vm2, %v946_v63, %v2445_v4  ;;  %v974_v6 = vsel %vm707_vm1, %v973_v48, %v2455_v10  ;;  %v1348_v63 = vld [vmem:[%s3976_s6 + $0xc0] sm:$0xff]  ;;  %v2185_v48 = vpack.c.bf16 %v1331_v18, %v1330_v14 }
 0x25f   :  { %v2464_v54 = vpop.permute.xlu1 %2463  ;;  %v975_v29 = vsel %vm709_vm2, %v974_v6, %v2460_v22  ;;  %v2187_v22 = vpack.c.bf16 %v1349_v58, %v1348_v63  ;;  %v1351_v6 = vld [vmem:[%s3976_s6 + $0xd8] sm:$0xff] }
 0x260   :  { %1265 = vmatmul.mubr.f32.gmra.mrb[52].mxu1 %v858_v9  ;;  %v2456_v9 = vunpack.i.h.bf16 %v2454_v39  ;;  %v2465_v60 = vunpack.i.l.bf16 %v2464_v54  ;;  %v2466_v25 = vunpack.i.h.bf16 %v2464_v54  ;;  %v1329_v54 = vld [vmem:[%s3976_s6 + $0x28] sm:$0xff] }
 0x261   :  { %1269 = vmatprep.mubr.f32.mxu1 %v889_v24  ;;  %v2181_v10 = vpack.c.bf16 %v1329_v54, %v1328_v52  ;;  %v1339_v52 = vld [vmem:[%s3976_s6 + $0x78] sm:$0xff] }
 0x262   :  { %v971_v42 = vsel %vm707_vm1, %v970_v27, %v2456_v9  ;;  %v1001_v24 = vsel %vm705_vm0, %v653_v21, %v2465_v60  ;;  %v998_v36 = vsel %vm705_vm0, %v645_v13, %v2466_v25  ;;  %v1332_v60 = vld [vmem:[%s3976_s6 + $0x40] sm:$0xff]  ;;  %v1334_v25 = vld [vmem:[%s3976_s6 + $0x50] sm:$0xff] }
 0x263   :  { %v2474_v3 = vpop.permute.xlu1 %2473  ;;  %v972_v46 = vsel %vm709_vm2, %v971_v42, %v2461_v20  ;;  %v1002_v61 = vsel %vm707_vm1, %v1001_v24, %v2470_v11  ;;  %v1335_v11 = vld [vmem:[%s3976_s6 + $0x58] sm:$0xff] }
 0x264   :  { %1270 = vmatmul.mubr.f32.gmra.mrb[54].mxu1 %v886_v30  ;;  %v2475_v2 = vunpack.i.l.bf16 %v2474_v3  ;;  %v2471_v30 = vunpack.i.h.bf16 %v2469_v28  ;;  %v2476_v62 = vunpack.i.h.bf16 %v2474_v3  ;;  %v1333_v28 = vld [vmem:[%s3976_s6 + $0x48] sm:$0xff]  ;;  %v1350_v3 = vld [vmem:[%s3976_s6 + $0xd0] sm:$0xff] }
 0x265   :  { %1274 = vmatprep.mubr.f32.mxu1 %v917_v35  ;;  %v1324_v35 = vld [vmem:[%s3976_s6] sm:$0xff]  ;;  %v2189_v27 = vpack.c.bf16 %v1333_v28, %v1332_v60  ;;  %v2191_v20 = vpack.c.bf16 %v1351_v6, %v1350_v3 }
 0x266   :  { %v1003_v53 = vsel %vm709_vm2, %v1002_v61, %v2475_v2  ;;  %v999_v51 = vsel %vm707_vm1, %v998_v36, %v2471_v30  ;;  %v2173_v39 = vpack.c.bf16 %v1325_v37, %v1324_v35  ;;  %v1353_v2 = vld [vmem:[%s3976_s6 + $0xe8] sm:$0xff]  ;;  %v1336_v30 = vld [vmem:[%s3976_s6 + $0x60] sm:$0xff]  ;;  %v1354_v61 = vld [vmem:[%s3976_s6 + $0xf0] sm:$0xff] }
 0x267   :  { %v1000_v19 = vsel %vm709_vm2, %v999_v51, %v2476_v62  ;;  %v1337_v62 = vld [vmem:[%s3976_s6 + $0x68] sm:$0xff]  ;;  %v1355_v36 = vld [vmem:[%s3976_s6 + $0xf8] sm:$0xff] }
 0x268   :  { %1275 = vmatmul.mubr.f32.gmra.mrb[56].mxu1 %v914_v41  ;;  %v2171_v41 = vpack.c.bf16 %v1341_v49, %v1340_v45  ;;  %v2197_v51 = vpack.c.bf16 %v1337_v62, %v1336_v30 }
 0x269   :  { %1279 = vmatprep.mubr.f32.mxu1 %v947_v55 }
 0x26a   :  { %2172 = vmatprep.subr.bf16.mxu1 %v2171_v41  ;;  %v1801_v41 = vld [vmem:[%s3977_s5] ss:$0 sm:$0xff] }
 0x26b   :  { %2174 = vmatpush3.bf16.msra.mxu1 %v2173_v39 }
 0x26c   :  { %1280 = vmatmul.mubr.f32.gmra.mrb[58].mxu1 %v944_v57  ;;  %2176 = vmatprep.subr.bf16.mxu1 %v2175_v12  ;;  %v1352_v57 = vld [vmem:[%s3976_s6 + $0xe0] sm:$0xff] }
 0x26d   :  { %1284 = vmatprep.mubr.f32.mxu1 %v975_v29  ;;  %v2193_v29 = vpack.c.bf16 %v1335_v11, %v1334_v25  ;;  %v2195_v24 = vpack.c.bf16 %v1353_v2, %v1352_v57 }
 0x26f   :  { %2178 = vmatpush3.bf16.msra.mxu1 %v2177_v7 }
 0x270   :  { %1285 = vmatmul.mubr.f32.gmra.mrb[60].mxu1 %v972_v46  ;;  %2180 = vmatprep.subr.bf16.mxu1 %v2179_v34  ;;  %v1338_v34 = vld [vmem:[%s3976_s6 + $0x70] sm:$0xff] }
 0x271   :  { %1289 = vmatprep.mubr.f32.mxu1 %v1003_v53 }
 0x273   :  { %2182 = vmatpush3.bf16.msra.mxu1 %v2181_v10 }
 0x274   :  { %1290 = vmatmul.mubr.f32.gmra.mrb[62].mxu1 %v1000_v19  ;;  %2184 = vmatprep.subr.bf16.mxu1 %v2183_v56  ;;  %v2199_v19 = vpack.c.bf16 %v1355_v36, %v1354_v61 }
 0x277   :  { %2186 = vmatpush3.bf16.msra.mxu1 %v2185_v48 }
 0x278   :  { %2188 = vmatprep.subr.bf16.mxu1 %v2187_v22 }
 0x27b   :  { %2190 = vmatpush3.bf16.msra.mxu1 %v2189_v27 }
 0x27c   :  { %2192 = vmatprep.subr.bf16.mxu1 %v2191_v20 }
 0x27f   :  { %2194 = vmatpush3.bf16.msra.mxu1 %v2193_v29 }
 0x280   :  { %2196 = vmatprep.subr.bf16.mxu1 %v2195_v24 }
 0x283   :  { %2198 = vmatpush3.bf16.msra.mxu1 %v2197_v51 }
 0x284   :  { %2200 = vmatprep.subr.bf16.mxu1 %v2199_v19 }
 0x293   :  { %v1840_v21 = vpop.f32.mrb[28].mxu1 }
 0x294   :  { %v1841_v50 = vpop.f32.mrb[29].mxu1 }
 0x295   :  { %v3663_v32 = vadd.f32 %v1841_v50, %v1840_v21 }
 0x297   :  { %v1142_v47 = vadd.f32 %v3663_v32, %v1801_v41  ;;  %v2201_v32 = vpack.c.bf16 %v1339_v52, %v1338_v34 }
 0x299   :  { %2202 = vmatpush3.bf16.msra.mxu1 %v2201_v32  ;;  %v1361_v32 = vld [vmem:[%s3976_s6 + $0x128] sm:$0xff] }
 0x29b   :  { %v1843_v15 = vpop.f32.mrb[30].mxu1 }
 0x29c   :  { %v1844_v40 = vpop.f32.mrb[31].mxu1 }
 0x29d   :  { %v3665_v33 = vadd.f32 %v1844_v40, %v1843_v15 }
 0x29f   :  { %v1147_v43 = vadd.f32 %v3665_v33, %v1801_v41  ;;  %v1372_v33 = vld [vmem:[%s3976_s6 + $0x180] sm:$0xff] }
 0x2a0   :  { %v2203_v14 = vpack.c.bf16 %v1373_v5, %v1372_v33 }
 0x2a2   :  { %2204 = vmatprep.subr.bf16.mxu1 %v2203_v14  ;;  %v1380_v14 = vld [vmem:[%s3976_s6 + $0x1c0] sm:$0xff] }
 0x2a3   :  { %v1846_v8 = vpop.f32.mrb[32].mxu1 }
 0x2a4   :  { %v1847_v38 = vpop.f32.mrb[33].mxu1 }
 0x2a5   :  { %v3667_v13 = vadd.f32 %v1847_v38, %v1846_v8 }
 0x2d3   :  { %v1849_v23 = vpop.f32.mrb[34].mxu1 }
 0x2d4   :  { %v1850_v4 = vpop.f32.mrb[35].mxu1 }
 0x2d5   :  { %v3711_v17 = vadd.f32 %v1850_v4, %v1849_v23  ;;  %v1152_v4 = vadd.f32 %v3667_v13, %v1801_v41 }
 0x2d7   :  { %v1157_v63 = vadd.f32 %v3711_v17, %v1801_v41 }
 0x2db   :  { %v1852_v9 = vpop.f32.mrb[36].mxu1 }
 0x2dc   :  { %v1853_v55 = vpop.f32.mrb[37].mxu1 }
 0x2dd   :  { %v3737_v16 = vadd.f32 %v1853_v55, %v1852_v9 }
 0x2df   :  { %v1162_v22 = vadd.f32 %v3737_v16, %v1801_v41 }
 0x2e3   :  { %v1855_v42 = vpop.f32.mrb[38].mxu1 }
 0x2e4   :  { %v1856_v46 = vpop.f32.mrb[39].mxu1 }
 0x2e5   :  { %v1857_v53 = vadd.f32 %v1856_v46, %v1855_v42 }
 0x2e7   :  { %v1167_v25 = vadd.f32 %v1857_v53, %v1801_v41 }
 0x313   :  { %v1858_v21 = vpop.f32.mrb[40].mxu1 }
 0x314   :  { %v1859_v50 = vpop.f32.mrb[41].mxu1 }
 0x315   :  { %v1860_v15 = vadd.f32 %v1859_v50, %v1858_v21 }
 0x317   :  { %v1172_v29 = vadd.f32 %v1860_v15, %v1801_v41  ;;  %v1356_v15 = vld [vmem:[%s3976_s6 + $0x100] sm:$0xff] }
 0x31b   :  { %v1861_v40 = vpop.f32.mrb[42].mxu1 }
 0x31c   :  { %v1862_v8 = vpop.f32.mrb[43].mxu1 }
 0x31d   :  { %v1863_v38 = vadd.f32 %v1862_v8, %v1861_v40 }
 0x31f   :  { %v1177_v62 = vadd.f32 %v1863_v38, %v1801_v41  ;;  %v1357_v38 = vld [vmem:[%s3976_s6 + $0x108] sm:$0xff] }
 0x323   :  { %v1864_v45 = vpop.f32.mrb[44].mxu1 }
 0x324   :  { %v1865_v49 = vpop.f32.mrb[45].mxu1 }
 0x325   :  { %v1866_v35 = vadd.f32 %v1865_v49, %v1864_v45  ;;  %v1374_v49 = vld [vmem:[%s3976_s6 + $0x190] sm:$0xff] }
 0x327   :  { %v1899_v37 = vpop.f32.mrb[46].mxu1  ;;  %v1182_v19 = vadd.f32 %v1866_v35, %v1801_v41  ;;  %v1375_v35 = vld [vmem:[%s3976_s6 + $0x198] sm:$0xff] }
 0x328   :  { %v1900_v26 = vpop.f32.mrb[47].mxu1 }
 0x329   :  { %v1901_v39 = vadd.f32 %v1900_v26, %v1899_v37 }
 0x32b   :  { %v3767_v12 = vadd.f32 %v1901_v39, %v1142_v47  ;;  %v1902_v1 = vpop.f32.mrb[48].mxu1  ;;  %v2205_v39 = vpack.c.bf16 %v1357_v38, %v1356_v15  ;;  %v1390_v15 = vld [vmem:[%s3976_s6 + $0x210] sm:$0xff]  ;;  %v1391_v38 = vld [vmem:[%s3976_s6 + $0x218] sm:$0xff] }
 0x32c   :  { %v1903_v59 = vpop.f32.mrb[49].mxu1 }
 0x32d   :  { %v1904_v31 = vadd.f32 %v1903_v59, %v1902_v1  ;;  %v1295_v41 = vmax.f32 %v3767_v12, 0.0  ;;  %v1376_v12 = vld [vmem:[%s3976_s6 + $0x1a0] sm:$0xff] }
 0x32f   :  { %v1257_v7 = vadd.f32 %v1904_v31, %v1147_v43  ;;  %v1905_v23 = vpop.f32.mrb[50].mxu1  ;;  %v2207_v43 = vpack.c.bf16 %v1375_v35, %v1374_v49  ;;  %v1358_v31 = vld [vmem:[%s3976_s6 + $0x110] sm:$0xff]  ;;  %v2239_v49 = vpack.c.bf16 %v1391_v38, %v1390_v15  ;;  %v2493_v35 = vmov 0.0  }
 0x330   :  { %v1906_v54 = vpop.f32.mrb[51].mxu1 }
 0x331   :  { %v1907_v44 = vadd.f32 %v1906_v54, %v1905_v23  ;;  %v1296_v60 = vmax.f32 %v1257_v7, 0.0  ;;  %v1359_v7 = vld [vmem:[%s3976_s6 + $0x118] sm:$0xff]  ;;  %v1377_v23 = vld [vmem:[%s3976_s6 + $0x1a8] sm:$0xff]  ;;  %v1360_v54 = vld [vmem:[%s3976_s6 + $0x120] sm:$0xff] }
 0x332   :  { %v2209_v34 = vpack.c.bf16 %v1359_v7, %v1358_v31  ;;  %v2211_v52 = vpack.c.bf16 %v1377_v23, %v1376_v12  ;;  %v2213_v33 = vpack.c.bf16 %v1361_v32, %v1360_v54  ;;  %v1702_v31 = vld [vmem:[%s3980_s10 + $0x8] sm:$0xff]  ;;  %v1703_v7 = vld [vmem:[%s3980_s10 + $0x10] sm:$0xff]  ;;  %v1704_v23 = vld [vmem:[%s3980_s10 + $0x18] sm:$0xff] }
 0x333   :  { %v1262_v10 = vadd.f32 %v1907_v44, %v1152_v4  ;;  %v1908_v56 = vpop.f32.mrb[52].mxu1  ;;  %v1378_v4 = vld [vmem:[%s3976_s6 + $0x1b0] sm:$0xff]  ;;  %v1379_v44 = vld [vmem:[%s3976_s6 + $0x1b8] sm:$0xff]  ;;  %v1706_v54 = vld [vmem:[%s3980_s10 + $0x28] sm:$0xff] }
 0x334   :  { %v1909_v18 = vpop.f32.mrb[53].mxu1  ;;  %v2215_v5 = vpack.c.bf16 %v1379_v44, %v1378_v4  ;;  %v1707_v4 = vld [vmem:[%s3980_s10 + $0x30] sm:$0xff]  ;;  %v1708_v44 = vld [vmem:[%s3980_s10 + $0x38] sm:$0xff] }
 0x335   :  { %v1910_v58 = vadd.f32 %v1909_v18, %v1908_v56  ;;  %v1297_v37 = vmax.f32 %v1262_v10, 0.0  ;;  %v1362_v10 = vld [vmem:[%s3976_s6 + $0x130] sm:$0xff]  ;;  %v1363_v56 = vld [vmem:[%s3976_s6 + $0x138] sm:$0xff]  ;;  %v1381_v18 = vld [vmem:[%s3976_s6 + $0x1c8] sm:$0xff] }
 0x337   :  { %v1267_v48 = vadd.f32 %v1910_v58, %v1157_v63  ;;  %v1911_v13 = vpop.f32.mrb[54].mxu1  ;;  %v2217_v63 = vpack.c.bf16 %v1363_v56, %v1362_v10  ;;  %v2219_v58 = vpack.c.bf16 %v1381_v18, %v1380_v14  ;;  %v1802_v14 = vld [vmem:[%s3981_s7] ss:$0 sm:$0xff] }
 0x338   :  { %v1912_v9 = vpop.f32.mrb[55].mxu1 }
 0x339   :  { %v1298_v28 = vmax.f32 %v1267_v48, 0.0  ;;  %v1913_v55 = vadd.f32 %v1912_v9, %v1911_v13  ;;  %v1364_v48 = vld [vmem:[%s3976_s6 + $0x140] sm:$0xff]  ;;  %v1365_v13 = vld [vmem:[%s3976_s6 + $0x148] sm:$0xff] }
 0x33b   :  { %v3785_v3 = vadd.f32 %v1913_v55, %v1162_v22  ;;  %v1914_v6 = vpop.f32.mrb[56].mxu1  ;;  %v2477_v27 = vpack.i.bf16 %v1296_v60, %v1298_v28  ;;  %v1382_v22 = vld [vmem:[%s3976_s6 + $0x1d0] sm:$0xff]  ;;  %v1383_v60 = vld [vmem:[%s3976_s6 + $0x1d8] sm:$0xff] }
 0x33c   :  { %v1915_v20 = vpop.f32.mrb[57].mxu1 }
 0x33d   :  { %v1916_v11 = vadd.f32 %v1915_v20, %v1914_v6  ;;  %2478 = vrot.lane.b32.xlu0 %v2477_v27, %s2490_s27  ;;  %v2221_v6 = vpack.c.bf16 %v1365_v13, %v1364_v48  ;;  %v2223_v20 = vpack.c.bf16 %v1383_v60, %v1382_v22  ;;  %v1804_v60 = vld [vmem:[%s3982_s9] ss:$0 sm:$0xff] }
 0x33f   :  { %v1277_v17 = vadd.f32 %v1916_v11, %v1167_v25  ;;  %v1917_v57 = vpop.f32.mrb[58].mxu1  ;;  %v1366_v25 = vld [vmem:[%s3976_s6 + $0x150] sm:$0xff]  ;;  %v1367_v11 = vld [vmem:[%s3976_s6 + $0x158] sm:$0xff] }
 0x340   :  { %v1918_v2 = vpop.f32.mrb[59].mxu1 }
 0x341   :  { %v1919_v42 = vadd.f32 %v1918_v2, %v1917_v57  ;;  %v1300_v21 = vmax.f32 %v1277_v17, 0.0  ;;  %v1384_v17 = vld [vmem:[%s3976_s6 + $0x1e0] sm:$0xff]  ;;  %v1385_v57 = vld [vmem:[%s3976_s6 + $0x1e8] sm:$0xff]  ;;  %v2225_v2 = vpack.c.bf16 %v1367_v11, %v1366_v25 }
 0x343   :  { %v3788_v24 = vadd.f32 %v1919_v42, %v1172_v29  ;;  %v1920_v16 = vpop.f32.mrb[60].mxu1  ;;  %v2227_v29 = vpack.c.bf16 %v1385_v57, %v1384_v17  ;;  %v1368_v42 = vld [vmem:[%s3976_s6 + $0x160] sm:$0xff] }
 0x344   :  { %v1921_v30 = vpop.f32.mrb[61].mxu1 }
 0x345   :  { %v1922_v46 = vadd.f32 %v1921_v30, %v1920_v16  ;;  %v1301_v28 = vmax.f32 %v3788_v24, 0.0  ;;  %v1369_v24 = vld [vmem:[%s3976_s6 + $0x168] sm:$0xff]  ;;  %v1386_v16 = vld [vmem:[%s3976_s6 + $0x1f0] sm:$0xff]  ;;  %v1387_v30 = vld [vmem:[%s3976_s6 + $0x1f8] sm:$0xff] }
 0x347   :  { %v1287_v61 = vadd.f32 %v1922_v46, %v1177_v62  ;;  %v1923_v36 = vpop.f32.mrb[62].mxu1  ;;  %v2229_v62 = vpack.c.bf16 %v1369_v24, %v1368_v42  ;;  %v2231_v46 = vpack.c.bf16 %v1387_v30, %v1386_v16 }
 0x348   :  { %v1924_v51 = vpop.f32.mrb[63].mxu1 }
 0x349   :  { %v1302_v53 = vmax.f32 %v1287_v61, 0.0  ;;  %v1925_v50 = vadd.f32 %v1924_v51, %v1923_v36  ;;  %v1370_v61 = vld [vmem:[%s3976_s6 + $0x170] sm:$0xff]  ;;  %v1371_v36 = vld [vmem:[%s3976_s6 + $0x178] sm:$0xff] }
 0x34a   :  { %v2233_v51 = vpack.c.bf16 %v1371_v36, %v1370_v61 }
 0x34b   :  { %v3790_v40 = vadd.f32 %v1925_v50, %v1182_v19  ;;  %v2482_v8 = vpack.i.bf16 %v1300_v21, %v1302_v53  ;;  %v1388_v19 = vld [vmem:[%s3976_s6 + $0x200] sm:$0xff]  ;;  %v1389_v21 = vld [vmem:[%s3976_s6 + $0x208] sm:$0xff]  ;;  %v1299_v50 = vmax.f32 %v3785_v3, 0.0 }
 0x34c   :  { %v1392_v3 = vld [vmem:[%s3976_s6 + $0x220] sm:$0xff] }
 0x34d   :  { %2483 = vrot.lane.b32.xlu1 %v2482_v8, %s2490_s27  ;;  %v2236_v8 = vpack.c.bf16 %v1389_v21, %v1388_v19 }
 0x3af   :  { %v2479_v45 = vpop.permute.xlu0 %2478 }
 0x3b0   :  { %v2481_v26 = vunpack.i.h.bf16 %v2479_v45  ;;  %v2480_v47 = vunpack.i.l.bf16 %v2479_v45 }
 0x3b2   :  { %v1321_v1 = vsel %vm707_vm1, %v1297_v37, %v2480_v47  ;;  %v1320_v59 = vsel %vm707_vm1, %v1295_v41, %v2481_v26  ;;  %v1393_v41 = vld [vmem:[%s3976_s6 + $0x228] sm:$0xff]  ;;  %v1394_v26 = vld [vmem:[%s3976_s6 + $0x230] sm:$0xff]  ;;  %v1395_v47 = vld [vmem:[%s3976_s6 + $0x238] sm:$0xff] }
 0x3b3   :  { %1470 = vmatprep.mubr.f32.mxu1 %v1321_v1  ;;  %v2242_v37 = vpack.c.bf16 %v1393_v41, %v1392_v3  ;;  %v1303_v1 = vmax.f32 %v3790_v40, 0.0  ;;  %v1701_v40 = vld [vmem:[%s3980_s10] sm:$0xff] }
 0x3b4   :  { %1471 = vmatmul.mubr.f32.vlgmr.msra.gmra.mrb[64].mxu1 %v1320_v59  ;;  %v1618_v59 = vld [vmem:[%s3978_s8] sm:$0xff]  ;;  %v2248_v12 = vpack.c.bf16 %v1702_v31, %v1701_v40 }
 0x3b5   :  { %2206 = vmatpush3.bf16.msra.mxu1 %v2205_v39  ;;  %v2245_v39 = vpack.c.bf16 %v1395_v47, %v1394_v26 }
 0x3b6   :  { %2208 = vmatprep.subr.bf16.mxu1 %v2207_v43  ;;  %v1617_v43 = vld [vmem:[%s3979_s1] sm:$0xff] }
 0x3b9   :  { %2210 = vmatpush3.bf16.msra.mxu1 %v2209_v34  ;;  %v2251_v34 = vpack.c.bf16 %v1704_v23, %v1703_v7 }
 0x3ba   :  { %2212 = vmatprep.subr.bf16.mxu1 %v2211_v52  ;;  %v1705_v52 = vld [vmem:[%s3980_s10 + $0x20] sm:$0xff] }
 0x3bb   :  { %v2254_v32 = vpack.c.bf16 %v1706_v54, %v1705_v52 }
 0x3bd   :  { %2214 = vmatpush3.bf16.msra.mxu1 %v2213_v33  ;;  %v2257_v33 = vpack.c.bf16 %v1708_v44, %v1707_v4 }
 0x3be   :  { %2216 = vmatprep.subr.bf16.mxu1 %v2215_v5 }
 0x3bf   :  { %v2484_v9 = vpop.permute.xlu1 %2483 }
 0x3c0   :  { %v2485_v55 = vunpack.i.l.bf16 %v2484_v9  ;;  %v2486_v53 = vunpack.i.h.bf16 %v2484_v9 }
 0x3c1   :  { %2218 = vmatpush3.bf16.msra.mxu1 %v2217_v63 }
 0x3c2   :  { %2220 = vmatprep.subr.bf16.mxu1 %v2219_v58  ;;  %v1323_v27 = vsel %vm707_vm1, %v1301_v28, %v2485_v55  ;;  %v1322_v45 = vsel %vm707_vm1, %v1299_v50, %v2486_v53 }
 0x3c3   :  { %1540 = vmatprep.mubr.f32.mxu1 %v1323_v27 }
 0x3c5   :  { %2222 = vmatpush3.bf16.msra.mxu1 %v2221_v6 }
 0x3c6   :  { %2224 = vmatprep.subr.bf16.mxu1 %v2223_v20  ;;  %v1806_v20 = vld [vmem:[%s3983_s11] ss:$0 sm:$0xff] }
 0x3c9   :  { %2226 = vmatpush3.bf16.msra.mxu1 %v2225_v2 }
 0x3ca   :  { %2228 = vmatprep.subr.bf16.mxu1 %v2227_v29 }
 0x3cd   :  { %2230 = vmatpush3.bf16.msra.mxu1 %v2229_v62 }
 0x3ce   :  { %2232 = vmatprep.subr.bf16.mxu1 %v2231_v46 }
 0x3d1   :  { %2234 = vmatpush3.bf16.msra.mxu1 %v2233_v51 }
 0x3d2   :  { %2235 = vmatprep.subr.bf16.mxu1 %v2488_v0 }
 0x3d4   :  { %1541 = vmatmul.mubr.f32.vlgmr.msra.gmra.mrb[66].mxu1 %v1322_v45 }
 0x3d5   :  { %2237 = vmatpush3.bf16.msra.mxu1 %v2236_v8  ;;  %2032 = vmatprep.mubr.msk.f32.mxu1 %vm2492_vm3, %v2493_v35 }
 0x3d6   :  { %2238 = vmatprep.subr.bf16.mxu1 %v2488_v0 }
 0x3d9   :  { %2240 = vmatpush3.bf16.msra.mxu1 %v2239_v49 }
 0x3da   :  { %2241 = vmatprep.subr.bf16.mxu1 %v2488_v0 }
 0x3dd   :  { %2243 = vmatpush3.bf16.msra.mxu1 %v2242_v37 }
 0x3de   :  { %2244 = vmatprep.subr.bf16.mxu1 %v2488_v0 }
 0x3e1   :  { %2246 = vmatpush3.bf16.msra.mxu1 %v2245_v39 }
 0x3e2   :  { %2035 = vmatprep.subr.mxu1 %v2493_v35 }
 0x3e4   :  { %2033 = vmatmul.mubr.msk.f32.vlgmr.msra.gmra.mrb[68].mxu1 %vm707_vm1, %v1303_v1 }
 0x3e5   :  { %2036 = vmatpush3.msra.mxu1 %v1618_v59  ;;  %2037 = vmatprep.mubr.msk.f32.mxu1 %vm2492_vm3, %v2493_v35 }
 0x3e6   :  { %2247 = vmatprep.subr.bf16.mxu1 %v2488_v0 }
 0x3e8   :  { %2038 = vmatmul.mubr.msk.f32.vlgmr.msra.gmra.mrb[70].mxu1 %vm1626_vm4, %v1617_v43 }
 0x3e9   :  { %2056 = vmatprep.mubr.msk.f32.mxu1 %vm2492_vm3, %v2493_v35  ;;  %2249 = vmatpush3.bf16.msra.mxu1 %v2248_v12 }
 0x3ea   :  { %2250 = vmatprep.subr.bf16.mxu1 %v2488_v0 }
 0x3ed   :  { %2252 = vmatpush3.bf16.msra.mxu1 %v2251_v34 }
 0x3ee   :  { %2253 = vmatprep.subr.bf16.mxu1 %v2488_v0 }
 0x3f1   :  { %2255 = vmatpush3.bf16.msra.mxu1 %v2254_v32 }
 0x3f2   :  { %2256 = vmatprep.subr.bf16.mxu1 %v2488_v0 }
 0x3f5   :  { %2258 = vmatpush3.bf16.msra.mxu1 %v2257_v33 }
 0x487   :  { %v1958_v5 = vpop.f32.mrb[64].mxu1 }
 0x488   :  { %v1959_v10 = vpop.f32.mrb[65].mxu1 }
 0x489   :  { %v1960_v56 = vadd.f32 %v1959_v10, %v1958_v5 }
 0x48b   :  { %v1473_v0 = vadd.f32 %v1960_v56, %v1802_v14 }
 0x4a7   :  { %v1993_v18 = vpop.f32.mrb[66].mxu1 }
 0x4a8   :  { %v1994_v63 = vpop.f32.mrb[67].mxu1 }
 0x4a9   :  { %v1995_v58 = vadd.f32 %v1994_v63, %v1993_v18 }
 0x4ab   :  { %v1543_v48 = vadd.f32 %v1995_v58, %v1473_v0 }
 0x4b7   :  { %v1612_v13 = vpop.f32.mrb[68].mxu1 }
 0x4b8   :  { %v1613_v9 = vadd.f32 %v1612_v13, %v1543_v48  ;;  %v2034_v22 = vpop.f32.mrb[69].mxu1 }
 0x4ba   :  { %v1616_v2 = vmax.f32 %v1613_v9, 0.0 }
 0x4bb   :  { %v1696_v28 = vpop.f32.mrb[70].mxu1 }
 0x4bc   :  { %v1697_v55 = vadd.f32 %v1804_v60, %v1696_v28  ;;  %v2039_v6 = vpop.f32.mrb[71].mxu1 }
 0x4be   :  { %v1700_v27 = vmax.f32 %v1697_v55, 0.0 }
 0x4c0   :  { %2057 = vmatmul.mubr.msk.f32.vlgmr.msra.gmra.mrb[72].mxu1 %vm707_vm1, %v1700_v27 }
 0x593   :  { %v1785_v25 = vpop.f32.mrb[72].mxu1 }
 0x594   :  { %v1786_v11 = vadd.f32 %v1806_v20, %v1785_v25  ;;  %v2058_v17 = vpop.f32.mrb[73].mxu1 }
 0x596   :  { %v1789_v57 = vmax.f32 %v1786_v11, 0.0 }
 0x598   :  { %1791 = vrot.lane.b32.xlu0 %v1789_v57, %s2490_s27 }
 0x60a   :  { %v1792_v29 = vpop.permute.xlu0 %1791 }
 0x60b   :  { %v1794_v42 = vsel %vm707_vm1, %v1616_v2, %v1792_v29 }
 0x60c   :  { %1795 = vst [vmem:[%s3984_s12] sm:$0xff] %v1794_v42 }

</bundles_post_ra>
